<compile_context>
chip_gen: v6e
topology: v6e:2x2x1
jax: 0.10.0
libtpu: 0.0.40
codegen_flags: <defaults>
</compile_context>

<pallas_src>
import functools
import math

import jax
import jax.numpy as jnp
from jax.experimental import pallas as pl
from jax.experimental.pallas import tpu as pltpu

ALPHA = 0.5          # fusion weight between learned and rule-based risk
BERT_DIM = 768       # BioBERT hidden size
FEATURE_DIM = 512    # module default feature_dim
LANE = 128           # lane width used to pad the 1-wide classifier output


# -----------------------------------------------------------------------------
# Fused kernel: the entire forward chain in one body, everything VMEM-resident.
# -----------------------------------------------------------------------------
def _fused_privacy_kernel(
    # activations / rule scores
    text_ref, graph_ref, rule_ref,
    # weights (pre-transposed to (K, N), bf16) and biases ((1, N), f32)
    wt_ref, bt_ref,          # text_proj    768 -> 512
    wv_ref, bv_ref,          # attn v_proj  512 -> 512
    wo_ref, bo_ref,          # attn out_proj 512 -> 512
    w1_ref, b1_ref,          # classifier[0] 512 -> 256
    w2_ref, b2_ref,          # classifier[2] 256 -> 1 (lane-padded to 128)
    # outputs
    final_ref, attn_ref, textf_ref,
    *, alpha,
):
    f32 = jnp.float32
    bf16 = jnp.bfloat16

    # ---- text_proj (computed to mirror the reference module; with a single
    #      query/key token it does not influence attn_output) -----------------
    tf = jnp.dot(text_ref[...], wt_ref[...], preferred_element_type=f32)
    tf = tf + bt_ref[...]
    textf_ref[...] = tf.astype(textf_ref.dtype)

    # ---- cross attention with L = S = 1: softmax over one key is exactly 1,
    #      so attn_output == out_proj(v_proj(graph_feats)) --------------------
    v = jnp.dot(graph_ref[...], wv_ref[...], preferred_element_type=f32)
    v = v + bv_ref[...]
    attn = jnp.dot(v.astype(bf16), wo_ref[...], preferred_element_type=f32)
    attn = attn + bo_ref[...]
    attn_ref[...] = attn.astype(attn_ref.dtype)

    # ---- classifier: Linear -> ReLU -> Linear -> Sigmoid, fused blend -------
    h = jnp.dot(attn.astype(bf16), w1_ref[...], preferred_element_type=f32)
    h = jnp.maximum(h + b1_ref[...], 0.0)
    z = jnp.dot(h.astype(bf16), w2_ref[...], preferred_element_type=f32)
    z = z + b2_ref[...]
    learned = jax.nn.sigmoid(z)
    final_ref[...] = (alpha * learned
                      + (1.0 - alpha) * rule_ref[...]).astype(final_ref.dtype)


# -----------------------------------------------------------------------------
# One-time parameter preparation (hoisted out of the hot path).
# -----------------------------------------------------------------------------
def _round_up(x, m):
    return ((x + m - 1) // m) * m


def prepare_params(params, feature_dim=FEATURE_DIM):
    """Pre-transpose to (K, N), cast weights to bf16, biases to f32 (1, N),
    and lane-pad the 1-wide classifier head.  Call once, reuse every forward."""
    def w_t(w):                                   # (N, K) torch layout -> (K, N) bf16
        return jnp.asarray(w, jnp.float32).T.astype(jnp.bfloat16)

    def b_row(b):                                 # (N,) -> (1, N) f32
        return jnp.asarray(b, jnp.float32).reshape(1, -1)

    prepared = {
        "wt": w_t(params["text_proj_w"]), "bt": b_row(params["text_proj_b"]),
        "wv": w_t(params["attn_v_w"]),    "bv": b_row(params["attn_v_b"]),
        "wo": w_t(params["attn_out_w"]),  "bo": b_row(params["attn_out_b"]),
        "w1": w_t(params["cls1_w"]),      "b1": b_row(params["cls1_b"]),
    }
    # classifier[2]: (1, 256) -> (256, 1) -> lane-pad to (256, 128) so the
    # final store is lane-dense; padded columns produce sigmoid(0)=0.5 which is
    # sliced off in the wrapper.
    hid = feature_dim // 2
    w2 = jnp.zeros((hid, LANE), jnp.bfloat16)
    w2 = w2.at[:, :1].set(w_t(params["cls2_w"]))
    b2 = jnp.zeros((1, LANE), jnp.float32)
    b2 = b2.at[:, :1].set(b_row(params["cls2_b"]))
    prepared["w2"] = w2
    prepared["b2"] = b2
    return prepared


# -----------------------------------------------------------------------------
# Forward wrapper: single fused pallas_call.
# -----------------------------------------------------------------------------
def privacy_detection_forward(prepared, text_cls, graph_feats, rule_scores,
                              *, alpha=ALPHA):
    B, bert_dim = text_cls.shape
    _, feature_dim = graph_feats.shape
    assert rule_scores.shape == (B, 1)

    # Pad batch to a sublane multiple; cast activation streams to bf16 once.
    B_pad = max(8, _round_up(B, 8))
    text_p = jnp.zeros((B_pad, bert_dim), jnp.bfloat16).at[:B].set(
        text_cls.astype(jnp.bfloat16))
    graph_p = jnp.zeros((B_pad, feature_dim), jnp.bfloat16).at[:B].set(
        graph_feats.astype(jnp.bfloat16))
    rule_p = jnp.zeros((B_pad, LANE), jnp.float32).at[:B, :1].set(
        rule_scores.astype(jnp.float32))

    vmem_spec = pl.BlockSpec(memory_space=pltpu.MemorySpace.VMEM)
    inputs = (
        text_p, graph_p, rule_p,
        prepared["wt"], prepared["bt"],
        prepared["wv"], prepared["bv"],
        prepared["wo"], prepared["bo"],
        prepared["w1"], prepared["b1"],
        prepared["w2"], prepared["b2"],
    )

    final_p, attn_p, textf_p = pl.pallas_call(
        functools.partial(_fused_privacy_kernel, alpha=alpha),
        out_shape=(
            jax.ShapeDtypeStruct((B_pad, LANE), jnp.float32),         # final
            jax.ShapeDtypeStruct((B_pad, feature_dim), jnp.float32),  # attn_output
            jax.ShapeDtypeStruct((B_pad, feature_dim), jnp.float32),  # text_feats
        ),
        in_specs=[vmem_spec] * len(inputs),
        out_specs=(vmem_spec, vmem_spec, vmem_spec),
        compiler_params=pltpu.CompilerParams(
            # Working set is ~3 MiB (bf16 weights + tiny activations); 16 MiB
            # leaves ample headroom even on v7x's 64 MiB physical VMEM.
            vmem_limit_bytes=16 * 1024 * 1024,
        ),
    )(*inputs)

    final_risk = final_p[:B, :1]
    attn_output = attn_p[:B]
    text_feats = textf_p[:B]
    return final_risk, attn_output, text_feats


# -----------------------------------------------------------------------------
# Pure-JAX reference (FULL MultiheadAttention math, bf16-in / f32-accumulate
# convention matching the kernel).
# -----------------------------------------------------------------------------
def reference_forward(params, text_cls, graph_feats, rule_scores):
    def lin(x, w, b, activation=None):
        z = jnp.dot(x.astype(jnp.bfloat16), w.T.astype(jnp.bfloat16),
                    preferred_element_type=jnp.float32) + b
        if activation == "relu":
            z = jnp.maximum(z, 0.0)
        elif activation == "sigmoid":
            z = jax.nn.sigmoid(z)
        return z

    B, E = graph_feats.shape
    H = 8
    d = E // H

    text_feats = lin(text_cls, params["text_proj_w"], params["text_proj_b"])

    q = lin(text_feats, params["attn_q_w"], params["attn_q_b"]).reshape(B, H, 1, d)
    k = lin(graph_feats, params["attn_k_w"], params["attn_k_b"]).reshape(B, H, 1, d)
    v = lin(graph_feats, params["attn_v_w"], params["attn_v_b"]).reshape(B, H, 1, d)
    scores = (q @ jnp.swapaxes(k, -1, -2)) / math.sqrt(d)   # (B, H, 1, 1)
    w_attn = jax.nn.softmax(scores, axis=-1)                # == 1 (single key)
    ctx = (w_attn @ v).reshape(B, E)
    attn_output = lin(ctx, params["attn_out_w"], params["attn_out_b"])

    h = lin(attn_output, params["cls1_w"], params["cls1_b"], "relu")
    learned = lin(h, params["cls2_w"], params["cls2_b"], "sigmoid")
    final = ALPHA * learned + (1.0 - ALPHA) * rule_scores
    return final, attn_output, text_feats


# -----------------------------------------------------------------------------
# Parameter init (mimics torch.nn.Linear default U(-1/sqrt(fan_in), 1/sqrt(fan_in)))
# -----------------------------------------------------------------------------
def _init_linear(key, in_dim, out_dim):
    kw, kb = jax.random.split(key)
    bound = 1.0 / math.sqrt(in_dim)
    w = jax.random.uniform(kw, (out_dim, in_dim), jnp.float32,
                           minval=-bound, maxval=bound)
    b = jax.random.uniform(kb, (out_dim,), jnp.float32,
                           minval=-bound, maxval=bound)
    return w, b


def init_params(key, bert_dim=BERT_DIM, feature_dim=FEATURE_DIM):
    ks = jax.random.split(key, 7)
    p = {}
    p["text_proj_w"], p["text_proj_b"] = _init_linear(ks[0], bert_dim, feature_dim)
    # MultiheadAttention in_proj slices (q/k/v) + out_proj.  q/k only matter to
    # the reference: with one key the softmax weight is 1 and they cancel.
    p["attn_q_w"], p["attn_q_b"] = _init_linear(ks[1], feature_dim, feature_dim)
    p["attn_k_w"], p["attn_k_b"] = _init_linear(ks[2], feature_dim, feature_dim)
    p["attn_v_w"], p["attn_v_b"] = _init_linear(ks[3], feature_dim, feature_dim)
    p["attn_out_w"], p["attn_out_b"] = _init_linear(ks[4], feature_dim, feature_dim)
    p["cls1_w"], p["cls1_b"] = _init_linear(ks[5], feature_dim, feature_dim // 2)
    p["cls2_w"], p["cls2_b"] = _init_linear(ks[6], feature_dim // 2, 1)
    return p


if __name__ == "__main__":
    B = 4  # small batch of prompts

    key = jax.random.PRNGKey(0)
    k_inp, k_par = jax.random.split(key)
    k_text, k_graph, k_rule = jax.random.split(k_inp, 3)

    # Stand-ins for the untranslatable front-ends (see TODO(synk) notes above).
    text_cls = jax.random.normal(k_text, (B, BERT_DIM), jnp.float32)
    graph_feats = jax.random.normal(k_graph, (B, FEATURE_DIM), jnp.float32)
    rule_scores = jax.random.uniform(k_rule, (B, 1), jnp.float32)

    params = init_params(k_par, BERT_DIM, FEATURE_DIM)
    prepared = prepare_params(params, FEATURE_DIM)   # one-time weight prep

    outs = privacy_detection_forward(prepared, text_cls, graph_feats, rule_scores)
    final_risk, attn_output, text_feats = jax.block_until_ready(outs)

    ref_final, ref_attn, ref_text = reference_forward(
        params, text_cls, graph_feats, rule_scores)

    assert final_risk.shape == (B, 1)
    assert attn_output.shape == (B, FEATURE_DIM)
    assert text_feats.shape == (B, FEATURE_DIM)
    assert jnp.allclose(text_feats, ref_text, atol=2e-3, rtol=2e-3)
    assert jnp.allclose(attn_output, ref_attn, atol=2e-3, rtol=2e-3)
    assert jnp.allclose(final_risk, ref_final, atol=2e-3, rtol=2e-3)
    assert bool(jnp.all((final_risk >= 0.0) & (final_risk <= 1.0)))

    print("KERNEL_OK")
</pallas_src>

<mosaic_0001>
module attributes {stable_mosaic.version = 11 : i64} {
  func.func @_fused_privacy_kernel(%arg0: memref<8x768xbf16, #tpu.memory_space<vmem>>, %arg1: memref<8x512xbf16, #tpu.memory_space<vmem>>, %arg2: memref<8x128xf32, #tpu.memory_space<vmem>>, %arg3: memref<768x512xbf16, #tpu.memory_space<vmem>>, %arg4: memref<1x512xf32, #tpu.memory_space<vmem>>, %arg5: memref<512x512xbf16, #tpu.memory_space<vmem>>, %arg6: memref<1x512xf32, #tpu.memory_space<vmem>>, %arg7: memref<512x512xbf16, #tpu.memory_space<vmem>>, %arg8: memref<1x512xf32, #tpu.memory_space<vmem>>, %arg9: memref<512x256xbf16, #tpu.memory_space<vmem>>, %arg10: memref<1x256xf32, #tpu.memory_space<vmem>>, %arg11: memref<256x128xbf16, #tpu.memory_space<vmem>>, %arg12: memref<1x128xf32, #tpu.memory_space<vmem>>, %arg13: memref<8x128xf32, #tpu.memory_space<vmem>>, %arg14: memref<8x512xf32, #tpu.memory_space<vmem>>, %arg15: memref<8x512xf32, #tpu.memory_space<vmem>>) attributes {dimension_semantics = [], scalar_prefetch = 0 : i64, scratch_operands = 0 : i64, tpu.core_type = #tpu.core_type<tc>} {
    %c0 = arith.constant 0 : index
    %c0_0 = arith.constant 0 : index
    %0 = vector.load %arg0[%c0, %c0_0] : memref<8x768xbf16, #tpu.memory_space<vmem>>, vector<8x768xbf16>
    %c0_1 = arith.constant 0 : index
    %c0_2 = arith.constant 0 : index
    %1 = vector.load %arg3[%c0_1, %c0_2] : memref<768x512xbf16, #tpu.memory_space<vmem>>, vector<768x512xbf16>
    %cst = arith.constant dense<0.000000e+00> : vector<8x512xf32>
    %2 = tpu.matmul %0, %1, %cst {dimension_numbers = #tpu.dot_dimension_numbers<[1], [0], [0], [1], [0, 0, 1, 1], [], []>} : vector<8x768xbf16>, vector<768x512xbf16>, vector<8x512xf32> -> vector<8x512xf32>
    %c0_3 = arith.constant 0 : index
    %c0_4 = arith.constant 0 : index
    %3 = vector.load %arg4[%c0_3, %c0_4] : memref<1x512xf32, #tpu.memory_space<vmem>>, vector<1x512xf32>
    %4 = vector.broadcast %3 : vector<1x512xf32> to vector<8x512xf32>
    %5 = arith.addf %2, %4 : vector<8x512xf32>
    %c0_5 = arith.constant 0 : index
    %c0_6 = arith.constant 0 : index
    %6 = vector.load %arg15[%c0_5, %c0_6] : memref<8x512xf32, #tpu.memory_space<vmem>>, vector<8x512xf32>
    tpu.vector_store %arg15[%c0_5, %c0_6], %5 {strides = array<i32>} : memref<8x512xf32, #tpu.memory_space<vmem>>, vector<8x512xf32>,
    %c0_7 = arith.constant 0 : index
    %c0_8 = arith.constant 0 : index
    %7 = vector.load %arg1[%c0_7, %c0_8] : memref<8x512xbf16, #tpu.memory_space<vmem>>, vector<8x512xbf16>
    %c0_9 = arith.constant 0 : index
    %c0_10 = arith.constant 0 : index
    %8 = vector.load %arg5[%c0_9, %c0_10] : memref<512x512xbf16, #tpu.memory_space<vmem>>, vector<512x512xbf16>
    %cst_11 = arith.constant dense<0.000000e+00> : vector<8x512xf32>
    %9 = tpu.matmul %7, %8, %cst_11 {dimension_numbers = #tpu.dot_dimension_numbers<[1], [0], [0], [1], [0, 0, 1, 1], [], []>} : vector<8x512xbf16>, vector<512x512xbf16>, vector<8x512xf32> -> vector<8x512xf32>
    %c0_12 = arith.constant 0 : index
    %c0_13 = arith.constant 0 : index
    %10 = vector.load %arg6[%c0_12, %c0_13] : memref<1x512xf32, #tpu.memory_space<vmem>>, vector<1x512xf32>
    %11 = vector.broadcast %10 : vector<1x512xf32> to vector<8x512xf32>
    %12 = arith.addf %9, %11 : vector<8x512xf32>
    %13 = arith.truncf %12 : vector<8x512xf32> to vector<8x512xbf16>
    %c0_14 = arith.constant 0 : index
    %c0_15 = arith.constant 0 : index
    %14 = vector.load %arg7[%c0_14, %c0_15] : memref<512x512xbf16, #tpu.memory_space<vmem>>, vector<512x512xbf16>
    %cst_16 = arith.constant dense<0.000000e+00> : vector<8x512xf32>
    %15 = tpu.matmul %13, %14, %cst_16 {dimension_numbers = #tpu.dot_dimension_numbers<[1], [0], [0], [1], [0, 0, 1, 1], [], []>} : vector<8x512xbf16>, vector<512x512xbf16>, vector<8x512xf32> -> vector<8x512xf32>
    %c0_17 = arith.constant 0 : index
    %c0_18 = arith.constant 0 : index
    %16 = vector.load %arg8[%c0_17, %c0_18] : memref<1x512xf32, #tpu.memory_space<vmem>>, vector<1x512xf32>
    %17 = vector.broadcast %16 : vector<1x512xf32> to vector<8x512xf32>
    %18 = arith.addf %15, %17 : vector<8x512xf32>
    %c0_19 = arith.constant 0 : index
    %c0_20 = arith.constant 0 : index
    %19 = vector.load %arg14[%c0_19, %c0_20] : memref<8x512xf32, #tpu.memory_space<vmem>>, vector<8x512xf32>
    tpu.vector_store %arg14[%c0_19, %c0_20], %18 {strides = array<i32>} : memref<8x512xf32, #tpu.memory_space<vmem>>, vector<8x512xf32>,
    %20 = arith.truncf %18 : vector<8x512xf32> to vector<8x512xbf16>
    %c0_21 = arith.constant 0 : index
    %c0_22 = arith.constant 0 : index
    %21 = vector.load %arg9[%c0_21, %c0_22] : memref<512x256xbf16, #tpu.memory_space<vmem>>, vector<512x256xbf16>
    %cst_23 = arith.constant dense<0.000000e+00> : vector<8x256xf32>
    %22 = tpu.matmul %20, %21, %cst_23 {dimension_numbers = #tpu.dot_dimension_numbers<[1], [0], [0], [1], [0, 0, 1, 1], [], []>} : vector<8x512xbf16>, vector<512x256xbf16>, vector<8x256xf32> -> vector<8x256xf32>
    %c0_24 = arith.constant 0 : index
    %c0_25 = arith.constant 0 : index
    %23 = vector.load %arg10[%c0_24, %c0_25] : memref<1x256xf32, #tpu.memory_space<vmem>>, vector<1x256xf32>
    %24 = vector.broadcast %23 : vector<1x256xf32> to vector<8x256xf32>
    %25 = arith.addf %22, %24 : vector<8x256xf32>
    %cst_26 = arith.constant 0.000000e+00 : f32
    %26 = vector.broadcast %cst_26 : f32 to vector<8x256xf32>
    %27 = arith.maximumf %25, %26 : vector<8x256xf32>
    %28 = arith.truncf %27 : vector<8x256xf32> to vector<8x256xbf16>
    %c0_27 = arith.constant 0 : index
    %c0_28 = arith.constant 0 : index
    %29 = vector.load %arg11[%c0_27, %c0_28] : memref<256x128xbf16, #tpu.memory_space<vmem>>, vector<256x128xbf16>
    %cst_29 = arith.constant dense<0.000000e+00> : vector<8x128xf32>
    %30 = tpu.matmul %28, %29, %cst_29 {dimension_numbers = #tpu.dot_dimension_numbers<[1], [0], [0], [1], [0, 0, 1, 1], [], []>} : vector<8x256xbf16>, vector<256x128xbf16>, vector<8x128xf32> -> vector<8x128xf32>
    %c0_30 = arith.constant 0 : index
    %c0_31 = arith.constant 0 : index
    %31 = vector.load %arg12[%c0_30, %c0_31] : memref<1x128xf32, #tpu.memory_space<vmem>>, vector<1x128xf32>
    %32 = vector.broadcast %31 : vector<1x128xf32> to vector<8x128xf32>
    %33 = arith.addf %30, %32 : vector<8x128xf32>
    %34 = arith.negf %33 : vector<8x128xf32>
    %35 = math.exp %34 : vector<8x128xf32>
    %cst_32 = arith.constant 1.000000e+00 : f32
    %36 = vector.broadcast %cst_32 : f32 to vector<8x128xf32>
    %37 = arith.addf %36, %35 : vector<8x128xf32>
    %38 = arith.divf %36, %37 : vector<8x128xf32>
    %cst_33 = arith.constant 5.000000e-01 : f32
    %39 = vector.broadcast %cst_33 : f32 to vector<8x128xf32>
    %40 = arith.mulf %39, %38 : vector<8x128xf32>
    %c0_34 = arith.constant 0 : index
    %c0_35 = arith.constant 0 : index
    %41 = vector.load %arg2[%c0_34, %c0_35] : memref<8x128xf32, #tpu.memory_space<vmem>>, vector<8x128xf32>
    %cst_36 = arith.constant 5.000000e-01 : f32
    %42 = vector.broadcast %cst_36 : f32 to vector<8x128xf32>
    %43 = arith.mulf %42, %41 : vector<8x128xf32>
    %44 = arith.addf %40, %43 : vector<8x128xf32>
    %c0_37 = arith.constant 0 : index
    %c0_38 = arith.constant 0 : index
    %45 = vector.load %arg13[%c0_37, %c0_38] : memref<8x128xf32, #tpu.memory_space<vmem>>, vector<8x128xf32>
    tpu.vector_store %arg13[%c0_37, %c0_38], %44 {strides = array<i32>} : memref<8x128xf32, #tpu.memory_space<vmem>>, vector<8x128xf32>,
    return
  }
}

</mosaic_0001>

<bundles_post_ra>
// kernel: tpu_custom_call.1
= control target key start
LH: loop header
LB: loop body
LE: loop exit
PB: predicated region body
PF: predicated region fallthrough
CT: control target
= control target key end

     0   :  { %21 = vsyncpa [#allocation3], 0  ;;  %s6140_s0 = inlined_call_operand.hbm [shape: bf16[8,768], index: 0, kind: input, shape index: {}]   ;;  %s6141_s1 = inlined_call_operand.hbm [shape: bf16[8,512], index: 1, kind: input, shape index: {}]   ;;  %s6142_s2 = inlined_call_operand.hbm [shape: f32[8,128], index: 2, kind: input, shape index: {}]   ;;  %s6143_s3 = inlined_call_operand.hbm [shape: bf16[768,512], index: 3, kind: input, shape index: {}]   ;;  %s6144_s4 = inlined_call_operand.vmem [shape: f32[1,512], index: 4, kind: input, shape index: {}]   ;;  %s6145_s5 = inlined_call_operand.hbm [shape: bf16[512,512], index: 5, kind: input, shape index: {}]   ;;  %s6146_s6 = inlined_call_operand.vmem [shape: f32[1,512], index: 6, kind: input, shape index: {}]   ;;  %s6147_s7 = inlined_call_operand.hbm [shape: bf16[512,512], index: 7, kind: input, shape index: {}]   ;;  %s6148_s8 = inlined_call_operand.vmem [shape: f32[1,512], index: 8, kind: input, shape index: {}]   ;;  %s6149_s9 = inlined_call_operand.hbm [shape: bf16[512,256], index: 9, kind: input, shape index: {}]   ;;  %s6150_s10 = inlined_call_operand.vmem [shape: f32[1,256], index: 10, kind: input, shape index: {}]   ;;  %s6151_s11 = inlined_call_operand.hbm [shape: bf16[256,128], index: 11, kind: input, shape index: {}]   ;;  %s6152_s12 = inlined_call_operand.vmem [shape: f32[1,128], index: 12, kind: input, shape index: {}]   ;;  %s6153_s13 = inlined_call_operand.hbm [shape: f32[8,128], index: 13, kind: output, shape index: {0}]   ;;  %s6154_s14 = inlined_call_operand.hbm [shape: f32[8,512], index: 14, kind: output, shape index: {1}]   ;;  %s6155_s15 = inlined_call_operand.hbm [shape: f32[8,512], index: 15, kind: output, shape index: {2}]  }
   0x1   :  { %22 = vsyncpa [#allocation6], 0 }
   0x2   :  { %23 = vsyncpa [#allocation9], 0 }
   0x3   :  { %24 = vsyncpa [#allocation12], 0 }
   0x4   :  { %25 = vsyncpa [#allocation15], 0 }
   0x5   :  { %26 = vsyncpa [#allocation4], 0 }
   0x6   :  { %27 = vsyncpa [#allocation18], 0  ;;  %s5862_s18 = smov [#allocation5]   ;;  %s5863_s20 = smov [#allocation8]  }
   0x7   :  { %s44_s19 = sshll.u32 %s5862_s18, 4  ;;  %s63_s21 = sshll.u32 %s5863_s20, 4  ;;  %s45_s19 = int_to_ptr.vmem [resolvable:$true] %s44_s19  ;;  %s64_s21 = int_to_ptr.vmem [resolvable:$true] %s63_s21 }
   0x8   :  { %s5636_s22 = scalar_lea.vmem %s45_s19, 256  ;;  %p5641_p1 = scmp.lt.s32.totalorder %s45_s19, %s45_s19 }
   0x9   :  { %p5637_p0 = scmp.ne.s32.totalorder %s45_s19, %s5636_s22  ;;  %p5642_p2 = scmp.lt.s32.totalorder %s5636_s22, %s5636_s22 }
   0xb   :  { %p5643_p3 = por %p5642_p2, %p5641_p1 }
   0xd   :  { %p5644_p4 = pnand %p5643_p3, %p5637_p0 }
   0xf   :  { %5647 = shalt.err (!%p5644_p4)
}
  0x10   :  { %47 = dma.hbm_to_vmem [thread:$0]  %s6141_s1, 256, %s45_s19, [#allocation6]  }
  0x11   :  { %s5656_s25 = scalar_lea.vmem %s64_s21, 24576  ;;  %p5661_p6 = scmp.lt.s32.totalorder %s64_s21, %s64_s21 }
  0x12   :  { %p5657_p5 = scmp.ne.s32.totalorder %s64_s21, %s5656_s25  ;;  %p5662_p7 = scmp.lt.s32.totalorder %s5656_s25, %s5656_s25 }
  0x14   :  { %p5663_p8 = por %p5662_p7, %p5661_p6 }
  0x16   :  { %p5664_p9 = pnand %p5663_p8, %p5657_p5 }
  0x18   :  { %5667 = shalt.err (!%p5664_p9)
}
  0x19   :  { %s5864_s26 = smov 256   ;;  %s5865_s27 = smov 16  }
  0x1a   :  { %69 = dma.hbm_to_vmem [thread:$0]  %s6143_s3, 24576, %s64_s21, [#allocation9], %s5864_s26, %s5864_s26, %s5865_s27  }
  0x1b   :  { %s5866_s30 = smov [#allocation11]   ;;  %s5867_s17 = smov [#allocation2]  }
  0x1c   :  { %s91_s16 = sshll.u32 %s5866_s30, 4  ;;  %s34_s1 = sshll.u32 %s5867_s17, 4  ;;  %s92_s16 = int_to_ptr.vmem [resolvable:$true] %s91_s16  ;;  %s35_s1 = int_to_ptr.vmem [resolvable:$true] %s34_s1 }
  0x1d   :  { %s5676_s18 = scalar_lea.vmem %s92_s16, 16384  ;;  %p5681_p11 = scmp.lt.s32.totalorder %s92_s16, %s92_s16 }
  0x1e   :  { %p5677_p10 = scmp.ne.s32.totalorder %s92_s16, %s5676_s18  ;;  %p5682_p12 = scmp.lt.s32.totalorder %s5676_s18, %s5676_s18 }
  0x20   :  { %p5683_p13 = por %p5682_p12, %p5681_p11 }
  0x22   :  { %p5684_p0 = pnand %p5683_p13, %p5677_p10 }
  0x24   :  { %5687 = shalt.err (!%p5684_p0)
}
  0x25   :  { %97 = dma.hbm_to_vmem [thread:$0]  %s6147_s7, 16384, %s92_s16, [#allocation12], %s5864_s26, %s5864_s26, %s5865_s27  }
  0x26   :  { %s5696_s3 = scalar_lea.vmem %s35_s1, 384  ;;  %p5701_p2 = scmp.lt.s32.totalorder %s35_s1, %s35_s1 }
  0x27   :  { %p5697_p1 = scmp.ne.s32.totalorder %s35_s1, %s5696_s3  ;;  %p5702_p3 = scmp.lt.s32.totalorder %s5696_s3, %s5696_s3 }
  0x29   :  { %p5703_p4 = por %p5702_p3, %p5701_p2 }
  0x2b   :  { %p5704_p5 = pnand %p5703_p4, %p5697_p1 }
  0x2d   :  { %5707 = shalt.err (!%p5704_p5)
}
  0x2e   :  { %37 = dma.hbm_to_vmem [thread:$0]  %s6140_s0, 384, %s35_s1, [#allocation3]  }
  0x2f   :  { %s5868_s23 = smov [#allocation7]   ;;  %s5869_s25 = smov [#allocation10]  }
  0x30   :  { %s54_s24 = sshll.u32 %s5868_s23, 4  ;;  %s77_s28 = sshll.u32 %s5869_s25, 4  ;;  %s55_s24 = int_to_ptr.vmem [resolvable:$true] %s54_s24  ;;  %s78_s28 = int_to_ptr.vmem [resolvable:$true] %s77_s28 }
  0x31   :  { %s5716_s29 = scalar_lea.vmem %s55_s24, 128  ;;  %p5721_p7 = scmp.lt.s32.totalorder %s55_s24, %s55_s24 }
  0x32   :  { %p5717_p6 = scmp.ne.s32.totalorder %s55_s24, %s5716_s29  ;;  %p5722_p8 = scmp.lt.s32.totalorder %s5716_s29, %s5716_s29 }
  0x34   :  { %p5723_p9 = por %p5722_p8, %p5721_p7 }
  0x36   :  { %p5724_p10 = pnand %p5723_p9, %p5717_p6 }
  0x38   :  { %5727 = shalt.err (!%p5724_p10)
}
  0x39   :  { %57 = dma.hbm_to_vmem [thread:$0]  %s6142_s2, 128, %s55_s24, [#allocation6]  }
  0x3a   :  { %s5736_s16 = scalar_lea.vmem %s78_s28, 16384  ;;  %p5741_p12 = scmp.lt.s32.totalorder %s78_s28, %s78_s28 }
  0x3b   :  { %p5737_p11 = scmp.ne.s32.totalorder %s78_s28, %s5736_s16  ;;  %p5742_p13 = scmp.lt.s32.totalorder %s5736_s16, %s5736_s16 }
  0x3d   :  { %p5743_p0 = por %p5742_p13, %p5741_p12 }
  0x3f   :  { %p5744_p1 = pnand %p5743_p0, %p5737_p11 }
  0x41   :  { %5747 = shalt.err (!%p5744_p1)
}
  0x42   :  { %83 = dma.hbm_to_vmem [thread:$0]  %s6145_s5, 16384, %s78_s28, [#allocation9], %s5864_s26, %s5864_s26, %s5865_s27  }
  0x43   :  { %s5870_s1 = smov [#allocation13]  }
  0x44   :  { %s105_s18 = sshll.u32 %s5870_s1, 4  ;;  %s106_s18 = int_to_ptr.vmem [resolvable:$true] %s105_s18 }
  0x45   :  { %s5756_s19 = scalar_lea.vmem %s106_s18, 8192  ;;  %p5761_p3 = scmp.lt.s32.totalorder %s106_s18, %s106_s18 }
  0x46   :  { %p5757_p2 = scmp.ne.s32.totalorder %s106_s18, %s5756_s19  ;;  %p5762_p4 = scmp.lt.s32.totalorder %s5756_s19, %s5756_s19 }
  0x48   :  { %p5763_p5 = por %p5762_p4, %p5761_p3 }
  0x4a   :  { %p5764_p6 = pnand %p5763_p5, %p5757_p2 }
  0x4c   :  { %5767 = shalt.err (!%p5764_p6)
}
  0x4d   :  { %s5871_s2 = smov 128   ;;  %s5872_s20 = smov 8  }
  0x4e   :  { %111 = dma.hbm_to_vmem [thread:$0]  %s6149_s9, 8192, %s106_s18, [#allocation12], %s5871_s2, %s5871_s2, %s5872_s20  }
  0x4f   :  { %s5873_s22 = smov [#allocation14]  }
  0x50   :  { %s119_s23 = sshll.u32 %s5873_s22, 4  ;;  %s120_s23 = int_to_ptr.vmem [resolvable:$true] %s119_s23 }
  0x51   :  { %s5776_s5 = scalar_lea.vmem %s120_s23, 2048  ;;  %p5781_p8 = scmp.lt.s32.totalorder %s120_s23, %s120_s23 }
  0x52   :  { %p5777_p7 = scmp.ne.s32.totalorder %s120_s23, %s5776_s5  ;;  %p5782_p9 = scmp.lt.s32.totalorder %s5776_s5, %s5776_s5 }
  0x54   :  { %p5783_p10 = por %p5782_p9, %p5781_p8 }
  0x56   :  { %p5784_p11 = pnand %p5783_p10, %p5777_p7 }
  0x58   :  { %5787 = shalt.err (!%p5784_p11)
}
  0x59   :  { %s5874_s26 = smov 64   ;;  %s5875_s27 = smov 4  }
  0x5a   :  { %125 = dma.hbm_to_vmem [thread:$0]  %s6151_s11, 2048, %s120_s23, [#allocation15], %s5874_s26, %s5874_s26, %s5875_s27  }
  0x5b   :  { %5848 = dma.done.wait [#allocation3], 384  }
  0x5c   :  { %5849 = vsyncadd [#allocation3], 4294966912 }
  0x5d   :  { %5850 = dma.done.wait [#allocation6], 384  }
  0x5e   :  { %5851 = vsyncadd [#allocation6], 4294966912 }
  0x5f   :  { %5852 = dma.done.wait [#allocation9], 40960  }
  0x60   :  { %5853 = vsyncadd [#allocation9], 4294926336 }
  0x61   :  { %5854 = dma.done.wait [#allocation12], 24576  }
  0x62   :  { %5855 = vsyncadd [#allocation12], 4294942720 }
  0x63   :  { %5856 = dma.done.wait [#allocation15], 2048  }
  0x64   :  { %5857 = vsyncadd [#allocation15], 4294965248  ;;  %v4830_v0 = vld [vmem:[#allocation8 + $0xe4] ss:$16 sps:$4 sm:$0xff]   ;;  %v4834_v2 = vld [vmem:[#allocation8 + $0xe0] ss:$16 sps:$4 sm:$0xff]  }
  0x65   :  { %v4832_v1 = vld [vmem:[#allocation8 + $0x2e4] ss:$16 sps:$4 sm:$0xff]   ;;  %1351 = vmatprep.subr.bf16.mxu0 %v4830_v0  ;;  %v4835_v3 = vld [vmem:[#allocation8 + $0x2e0] ss:$16 sps:$4 sm:$0xff]   ;;  %v154_v48 = vld [vmem:[#allocation2 + $0x8] sm:$0xff]  ;;  %s5876_s30 = smov [#allocation17]  }
  0x66   :  { %1392 = vmatprep.subr.bf16.mxu1 %v4832_v1  ;;  %v4836_v4 = vld [vmem:[#allocation8 + $0xc4] ss:$16 sps:$4 sm:$0xff]   ;;  %1352 = vmatpush1.bf16.msra.mxu0 %v4834_v2  ;;  %v4840_v6 = vld [vmem:[#allocation8 + $0xc0] ss:$16 sps:$4 sm:$0xff]   ;;  %v5994_v51 = vcombine.high %v154_v48, %v154_v48 }
  0x67   :  { %1393 = vmatpush1.bf16.msra.mxu1 %v4835_v3  ;;  %v4838_v5 = vld [vmem:[#allocation8 + $0x2c4] ss:$16 sps:$4 sm:$0xff]   ;;  %1353 = vmatprep.subr.bf16.mxu0 %v4836_v4  ;;  %v4841_v7 = vld [vmem:[#allocation8 + $0x2c0] ss:$16 sps:$4 sm:$0xff]  }
  0x68   :  { %1394 = vmatprep.subr.bf16.mxu1 %v4838_v5  ;;  %v4842_v8 = vld [vmem:[#allocation8 + $0xa4] ss:$16 sps:$4 sm:$0xff]   ;;  %v4846_v10 = vld [vmem:[#allocation8 + $0xa0] ss:$16 sps:$4 sm:$0xff]   ;;  %1424 = vmatprep.mubr.bf16.mxu1 %v5994_v51  ;;  %v4935_v5 = vld [vmem:[#allocation8 + $0xec] ss:$16 sps:$4 sm:$0xff]  }
  0x69   :  { %v4844_v9 = vld [vmem:[#allocation8 + $0x2a4] ss:$16 sps:$4 sm:$0xff]   ;;  %v4847_v11 = vld [vmem:[#allocation8 + $0x2a0] ss:$16 sps:$4 sm:$0xff]  }
  0x6a   :  { %1354 = vmatpush1.bf16.msra.mxu0 %v4840_v6  ;;  %v4848_v12 = vld [vmem:[#allocation8 + $0x84] ss:$16 sps:$4 sm:$0xff]   ;;  %v4852_v14 = vld [vmem:[#allocation8 + $0x80] ss:$16 sps:$4 sm:$0xff]  }
  0x6b   :  { %1395 = vmatpush1.bf16.msra.mxu1 %v4841_v7  ;;  %1355 = vmatprep.subr.bf16.mxu0 %v4842_v8  ;;  %v4850_v13 = vld [vmem:[#allocation8 + $0x284] ss:$16 sps:$4 sm:$0xff]   ;;  %v4853_v15 = vld [vmem:[#allocation8 + $0x280] ss:$16 sps:$4 sm:$0xff]   ;;  %v6000_v7 = vcombine.low %v154_v48, %v154_v48 }
  0x6c   :  { %1396 = vmatprep.subr.bf16.mxu1 %v4844_v9  ;;  %v4854_v16 = vld [vmem:[#allocation8 + $0x64] ss:$16 sps:$4 sm:$0xff]   ;;  %v4858_v18 = vld [vmem:[#allocation8 + $0x60] ss:$16 sps:$4 sm:$0xff]   ;;  %v4933_v9 = vld [vmem:[#allocation8 + $0xe8] ss:$16 sps:$4 sm:$0xff]  }
  0x6d   :  { %v4856_v17 = vld [vmem:[#allocation8 + $0x264] ss:$16 sps:$4 sm:$0xff]   ;;  %v4859_v19 = vld [vmem:[#allocation8 + $0x260] ss:$16 sps:$4 sm:$0xff]  }
  0x6e   :  { %1356 = vmatpush1.bf16.msra.mxu0 %v4846_v10  ;;  %v4860_v20 = vld [vmem:[#allocation8 + $0x44] ss:$16 sps:$4 sm:$0xff]   ;;  %v4864_v22 = vld [vmem:[#allocation8 + $0x40] ss:$16 sps:$4 sm:$0xff]  }
  0x6f   :  { %1397 = vmatpush1.bf16.msra.mxu1 %v4847_v11  ;;  %1357 = vmatprep.subr.bf16.mxu0 %v4848_v12  ;;  %v4862_v21 = vld [vmem:[#allocation8 + $0x244] ss:$16 sps:$4 sm:$0xff]   ;;  %v4865_v23 = vld [vmem:[#allocation8 + $0x240] ss:$16 sps:$4 sm:$0xff]   ;;  %v4941_v11 = vld [vmem:[#allocation8 + $0xcc] ss:$16 sps:$4 sm:$0xff]  }
  0x70   :  { %1398 = vmatprep.subr.bf16.mxu1 %v4850_v13  ;;  %v4866_v24 = vld [vmem:[#allocation8 + $0x24] ss:$16 sps:$4 sm:$0xff]   ;;  %v4870_v26 = vld [vmem:[#allocation8 + $0x20] ss:$16 sps:$4 sm:$0xff]   ;;  %v4939_v13 = vld [vmem:[#allocation8 + $0xc8] ss:$16 sps:$4 sm:$0xff]  }
  0x71   :  { %v4868_v25 = vld [vmem:[#allocation8 + $0x224] ss:$16 sps:$4 sm:$0xff]   ;;  %v4871_v27 = vld [vmem:[#allocation8 + $0x220] ss:$16 sps:$4 sm:$0xff]  }
  0x72   :  { %1358 = vmatpush1.bf16.msra.mxu0 %v4852_v14  ;;  %v4872_v28 = vld [vmem:[#allocation8 + $0x4] ss:$16 sps:$4 sm:$0xff]   ;;  %v4876_v30 = vld [vmem:[#allocation8] ss:$16 sps:$4 sm:$0xff]  }
  0x73   :  { %1399 = vmatpush1.bf16.msra.mxu1 %v4853_v15  ;;  %1359 = vmatprep.subr.bf16.mxu0 %v4854_v16  ;;  %v4874_v29 = vld [vmem:[#allocation8 + $0x204] ss:$16 sps:$4 sm:$0xff]   ;;  %v4877_v31 = vld [vmem:[#allocation8 + $0x200] ss:$16 sps:$4 sm:$0xff]   ;;  %v4947_v15 = vld [vmem:[#allocation8 + $0xac] ss:$16 sps:$4 sm:$0xff]  }
  0x74   :  { %1400 = vmatprep.subr.bf16.mxu1 %v4856_v17  ;;  %v4878_v32 = vld [vmem:[#allocation8 + $0x1e4] ss:$16 sps:$4 sm:$0xff]   ;;  %v4882_v34 = vld [vmem:[#allocation8 + $0x1e0] ss:$16 sps:$4 sm:$0xff]   ;;  %v4945_v17 = vld [vmem:[#allocation8 + $0xa8] ss:$16 sps:$4 sm:$0xff]  }
  0x75   :  { %v4880_v33 = vld [vmem:[#allocation8 + $0x3e4] ss:$16 sps:$4 sm:$0xff]   ;;  %v4883_v35 = vld [vmem:[#allocation8 + $0x3e0] ss:$16 sps:$4 sm:$0xff]  }
  0x76   :  { %1360 = vmatpush1.bf16.msra.mxu0 %v4858_v18  ;;  %v4884_v36 = vld [vmem:[#allocation8 + $0x1c4] ss:$16 sps:$4 sm:$0xff]   ;;  %v4888_v38 = vld [vmem:[#allocation8 + $0x1c0] ss:$16 sps:$4 sm:$0xff]  }
  0x77   :  { %1401 = vmatpush1.bf16.msra.mxu1 %v4859_v19  ;;  %1361 = vmatprep.subr.bf16.mxu0 %v4860_v20  ;;  %v4886_v37 = vld [vmem:[#allocation8 + $0x3c4] ss:$16 sps:$4 sm:$0xff]   ;;  %v4889_v39 = vld [vmem:[#allocation8 + $0x3c0] ss:$16 sps:$4 sm:$0xff]   ;;  %v4953_v19 = vld [vmem:[#allocation8 + $0x8c] ss:$16 sps:$4 sm:$0xff]  }
  0x78   :  { %1402 = vmatprep.subr.bf16.mxu1 %v4862_v21  ;;  %v4890_v40 = vld [vmem:[#allocation8 + $0x1a4] ss:$16 sps:$4 sm:$0xff]   ;;  %v4894_v42 = vld [vmem:[#allocation8 + $0x1a0] ss:$16 sps:$4 sm:$0xff]   ;;  %v4951_v21 = vld [vmem:[#allocation8 + $0x88] ss:$16 sps:$4 sm:$0xff]  }
  0x79   :  { %v4892_v41 = vld [vmem:[#allocation8 + $0x3a4] ss:$16 sps:$4 sm:$0xff]   ;;  %v4895_v43 = vld [vmem:[#allocation8 + $0x3a0] ss:$16 sps:$4 sm:$0xff]  }
  0x7a   :  { %1362 = vmatpush1.bf16.msra.mxu0 %v4864_v22  ;;  %v4896_v44 = vld [vmem:[#allocation8 + $0x184] ss:$16 sps:$4 sm:$0xff]   ;;  %v4900_v49 = vld [vmem:[#allocation8 + $0x180] ss:$16 sps:$4 sm:$0xff]  }
  0x7b   :  { %1403 = vmatpush1.bf16.msra.mxu1 %v4865_v23  ;;  %1363 = vmatprep.subr.bf16.mxu0 %v4866_v24  ;;  %v4898_v45 = vld [vmem:[#allocation8 + $0x384] ss:$16 sps:$4 sm:$0xff]   ;;  %v4901_v50 = vld [vmem:[#allocation8 + $0x380] ss:$16 sps:$4 sm:$0xff]   ;;  %v4959_v23 = vld [vmem:[#allocation8 + $0x6c] ss:$16 sps:$4 sm:$0xff]  }
  0x7c   :  { %1404 = vmatprep.subr.bf16.mxu1 %v4868_v25  ;;  %v153_v46 = vld [vmem:[#allocation2] sm:$0xff]  ;;  %v4957_v25 = vld [vmem:[#allocation8 + $0x68] ss:$16 sps:$4 sm:$0xff]  }
  0x7d   :  { %v5992_v47 = vcombine.high %v153_v46, %v153_v46  ;;  %v4902_v52 = vld [vmem:[#allocation8 + $0x164] ss:$16 sps:$4 sm:$0xff]   ;;  %v4906_v54 = vld [vmem:[#allocation8 + $0x160] ss:$16 sps:$4 sm:$0xff]   ;;  %v5998_v6 = vcombine.low %v153_v46, %v153_v46 }
  0x7e   :  { %1364 = vmatpush1.bf16.msra.mxu0 %v4870_v26  ;;  %v4904_v53 = vld [vmem:[#allocation8 + $0x364] ss:$16 sps:$4 sm:$0xff]   ;;  %v4907_v55 = vld [vmem:[#allocation8 + $0x360] ss:$16 sps:$4 sm:$0xff]  }
  0x7f   :  { %1405 = vmatpush1.bf16.msra.mxu1 %v4871_v27  ;;  %1365 = vmatprep.subr.bf16.mxu0 %v4872_v28  ;;  %v4908_v56 = vld [vmem:[#allocation8 + $0x144] ss:$16 sps:$4 sm:$0xff]   ;;  %v4912_v58 = vld [vmem:[#allocation8 + $0x140] ss:$16 sps:$4 sm:$0xff]   ;;  %v4965_v27 = vld [vmem:[#allocation8 + $0x4c] ss:$16 sps:$4 sm:$0xff]  }
  0x80   :  { %1406 = vmatprep.subr.bf16.mxu1 %v4874_v29  ;;  %1383 = vmatprep.mubr.bf16.mxu0 %v5992_v47  ;;  %v4910_v57 = vld [vmem:[#allocation8 + $0x344] ss:$16 sps:$4 sm:$0xff]   ;;  %v4913_v59 = vld [vmem:[#allocation8 + $0x340] ss:$16 sps:$4 sm:$0xff]   ;;  %v4963_v29 = vld [vmem:[#allocation8 + $0x48] ss:$16 sps:$4 sm:$0xff]  }
  0x81   :  { %v4914_v60 = vld [vmem:[#allocation8 + $0x124] ss:$16 sps:$4 sm:$0xff]   ;;  %v4918_v62 = vld [vmem:[#allocation8 + $0x120] ss:$16 sps:$4 sm:$0xff]  }
  0x82   :  { %1366 = vmatpush1.bf16.msra.mxu0 %v4876_v30  ;;  %v4916_v61 = vld [vmem:[#allocation8 + $0x324] ss:$16 sps:$4 sm:$0xff]   ;;  %v4919_v63 = vld [vmem:[#allocation8 + $0x320] ss:$16 sps:$4 sm:$0xff]  }
  0x83   :  { %1407 = vmatpush1.bf16.msra.mxu1 %v4877_v31  ;;  %1367 = vmatprep.subr.bf16.mxu0 %v4878_v32  ;;  %v4920_v0 = vld [vmem:[#allocation8 + $0x104] ss:$16 sps:$4 sm:$0xff]   ;;  %v4924_v2 = vld [vmem:[#allocation8 + $0x100] ss:$16 sps:$4 sm:$0xff]   ;;  %v4971_v31 = vld [vmem:[#allocation8 + $0x2c] ss:$16 sps:$4 sm:$0xff]  }
  0x84   :  { %1408 = vmatprep.subr.bf16.mxu1 %v4880_v33  ;;  %v4922_v1 = vld [vmem:[#allocation8 + $0x304] ss:$16 sps:$4 sm:$0xff]   ;;  %v4925_v3 = vld [vmem:[#allocation8 + $0x300] ss:$16 sps:$4 sm:$0xff]  }
  0x85   :  { %v4932_v4 = vld [vmem:[#allocation8 + $0x4e4] ss:$16 sps:$4 sm:$0xff]   ;;  %v4930_v8 = vld [vmem:[#allocation8 + $0x4e0] ss:$16 sps:$4 sm:$0xff]  }
  0x86   :  { %1368 = vmatpush2.bf16.msra.mxu0 %v4882_v34  ;;  %v4938_v10 = vld [vmem:[#allocation8 + $0x4c4] ss:$16 sps:$4 sm:$0xff]   ;;  %v4936_v12 = vld [vmem:[#allocation8 + $0x4c0] ss:$16 sps:$4 sm:$0xff]  }
  0x87   :  { %1409 = vmatpush2.bf16.msra.mxu1 %v4883_v35  ;;  %1369 = vmatprep.subr.bf16.mxu0 %v4884_v36  ;;  %v4944_v14 = vld [vmem:[#allocation8 + $0x4a4] ss:$16 sps:$4 sm:$0xff]   ;;  %v4942_v16 = vld [vmem:[#allocation8 + $0x4a0] ss:$16 sps:$4 sm:$0xff]   ;;  %v4969_v35 = vld [vmem:[#allocation8 + $0x28] ss:$16 sps:$4 sm:$0xff]  }
  0x88   :  { %1410 = vmatprep.subr.bf16.mxu1 %v4886_v37  ;;  %v4950_v18 = vld [vmem:[#allocation8 + $0x484] ss:$16 sps:$4 sm:$0xff]   ;;  %v4948_v20 = vld [vmem:[#allocation8 + $0x480] ss:$16 sps:$4 sm:$0xff]   ;;  %v4977_v37 = vld [vmem:[#allocation8 + $0xc] ss:$16 sps:$4 sm:$0xff]  }
  0x89   :  { %v4956_v22 = vld [vmem:[#allocation8 + $0x464] ss:$16 sps:$4 sm:$0xff]   ;;  %v4954_v24 = vld [vmem:[#allocation8 + $0x460] ss:$16 sps:$4 sm:$0xff]  }
  0x8a   :  { %1370 = vmatpush2.bf16.msra.mxu0 %v4888_v38  ;;  %v4962_v26 = vld [vmem:[#allocation8 + $0x444] ss:$16 sps:$4 sm:$0xff]   ;;  %v4960_v28 = vld [vmem:[#allocation8 + $0x440] ss:$16 sps:$4 sm:$0xff]  }
  0x8b   :  { %1411 = vmatpush2.bf16.msra.mxu1 %v4889_v39  ;;  %1371 = vmatprep.subr.bf16.mxu0 %v4890_v40  ;;  %v4968_v30 = vld [vmem:[#allocation8 + $0x424] ss:$16 sps:$4 sm:$0xff]   ;;  %v4966_v33 = vld [vmem:[#allocation8 + $0x420] ss:$16 sps:$4 sm:$0xff]   ;;  %v4975_v39 = vld [vmem:[#allocation8 + $0x8] ss:$16 sps:$4 sm:$0xff]  }
  0x8c   :  { %1412 = vmatprep.subr.bf16.mxu1 %v4892_v41  ;;  %v6005_v32 = vld [vmem:[#allocation2 + $0x10] sm:$0xff]  ;;  %v4983_v41 = vld [vmem:[#allocation8 + $0x1ec] ss:$16 sps:$4 sm:$0xff]  }
  0x8d   :  { %v6009_v34 = vcombine.high %v6005_v32, %v6005_v32  ;;  %v4974_v36 = vld [vmem:[#allocation8 + $0x404] ss:$16 sps:$4 sm:$0xff]   ;;  %v4972_v38 = vld [vmem:[#allocation8 + $0x400] ss:$16 sps:$4 sm:$0xff]  }
  0x8e   :  { %1372 = vmatpush2.bf16.msra.mxu0 %v4894_v42  ;;  %v4980_v40 = vld [vmem:[#allocation8 + $0x5e4] ss:$16 sps:$4 sm:$0xff]   ;;  %v4978_v42 = vld [vmem:[#allocation8 + $0x5e0] ss:$16 sps:$4 sm:$0xff]  }
  0x8f   :  { %1413 = vmatpush2.bf16.msra.mxu1 %v4895_v43  ;;  %1373 = vmatprep.subr.bf16.mxu0 %v4896_v44  ;;  %v4981_v43 = vld [vmem:[#allocation8 + $0x1e8] ss:$16 sps:$4 sm:$0xff]   ;;  %v4986_v44 = vld [vmem:[#allocation8 + $0x5c4] ss:$16 sps:$4 sm:$0xff]   ;;  %v4984_v46 = vld [vmem:[#allocation8 + $0x5c0] ss:$16 sps:$4 sm:$0xff]  }
  0x90   :  { %1414 = vmatprep.subr.bf16.mxu1 %v4898_v45  ;;  %v4989_v45 = vld [vmem:[#allocation8 + $0x1cc] ss:$16 sps:$4 sm:$0xff]   ;;  %v4992_v48 = vld [vmem:[#allocation8 + $0x5a4] ss:$16 sps:$4 sm:$0xff]  }
  0x92   :  { %1374 = vmatpush2.bf16.msra.mxu0 %v4900_v49  ;;  %v4995_v49 = vld [vmem:[#allocation8 + $0x1ac] ss:$16 sps:$4 sm:$0xff]  }
  0x93   :  { %1415 = vmatpush2.bf16.msra.mxu1 %v4901_v50  ;;  %1375 = vmatprep.subr.bf16.mxu0 %v4902_v52  ;;  %v4990_v50 = vld [vmem:[#allocation8 + $0x5a0] ss:$16 sps:$4 sm:$0xff]   ;;  %v4993_v52 = vld [vmem:[#allocation8 + $0x1a8] ss:$16 sps:$4 sm:$0xff]  }
  0x94   :  { %1416 = vmatprep.subr.bf16.mxu1 %v4904_v53  ;;  %v4998_v53 = vld [vmem:[#allocation8 + $0x584] ss:$16 sps:$4 sm:$0xff]  }
  0x96   :  { %1376 = vmatpush2.bf16.msra.mxu0 %v4906_v54  ;;  %v5001_v54 = vld [vmem:[#allocation8 + $0x18c] ss:$16 sps:$4 sm:$0xff]  }
  0x97   :  { %1417 = vmatpush2.bf16.msra.mxu1 %v4907_v55  ;;  %1377 = vmatprep.subr.bf16.mxu0 %v4908_v56  ;;  %v4996_v55 = vld [vmem:[#allocation8 + $0x580] ss:$16 sps:$4 sm:$0xff]   ;;  %v4999_v56 = vld [vmem:[#allocation8 + $0x188] ss:$16 sps:$4 sm:$0xff]  }
  0x98   :  { %1418 = vmatprep.subr.bf16.mxu1 %v4910_v57  ;;  %v5004_v57 = vld [vmem:[#allocation8 + $0x564] ss:$16 sps:$4 sm:$0xff]  }
  0x9a   :  { %1378 = vmatpush2.bf16.msra.mxu0 %v4912_v58  ;;  %v5007_v58 = vld [vmem:[#allocation8 + $0x16c] ss:$16 sps:$4 sm:$0xff]  }
  0x9b   :  { %1419 = vmatpush2.bf16.msra.mxu1 %v4913_v59  ;;  %1379 = vmatprep.subr.bf16.mxu0 %v4914_v60  ;;  %v5002_v59 = vld [vmem:[#allocation8 + $0x560] ss:$16 sps:$4 sm:$0xff]   ;;  %v5005_v60 = vld [vmem:[#allocation8 + $0x168] ss:$16 sps:$4 sm:$0xff]  }
  0x9c   :  { %1420 = vmatprep.subr.bf16.mxu1 %v4916_v61  ;;  %v5010_v61 = vld [vmem:[#allocation8 + $0x544] ss:$16 sps:$4 sm:$0xff]  }
  0x9e   :  { %1380 = vmatpush2.bf16.msra.mxu0 %v4918_v62  ;;  %v5013_v62 = vld [vmem:[#allocation8 + $0x14c] ss:$16 sps:$4 sm:$0xff]  }
  0x9f   :  { %1421 = vmatpush2.bf16.msra.mxu1 %v4919_v63  ;;  %1381 = vmatprep.subr.bf16.mxu0 %v4920_v0  ;;  %v5008_v63 = vld [vmem:[#allocation8 + $0x540] ss:$16 sps:$4 sm:$0xff]   ;;  %v5011_v0 = vld [vmem:[#allocation8 + $0x148] ss:$16 sps:$4 sm:$0xff]  }
  0xa0   :  { %1422 = vmatprep.subr.bf16.mxu1 %v4922_v1  ;;  %v5016_v1 = vld [vmem:[#allocation8 + $0x524] ss:$16 sps:$4 sm:$0xff]  }
  0xa2   :  { %1382 = vmatpush2.bf16.msra.mxu0 %v4924_v2  ;;  %v5019_v2 = vld [vmem:[#allocation8 + $0x12c] ss:$16 sps:$4 sm:$0xff]  }
  0xa3   :  { %1423 = vmatpush2.bf16.msra.mxu1 %v4925_v3  ;;  %1433 = vmatprep.subr.bf16.mxu0 %v4932_v4  ;;  %v5014_v3 = vld [vmem:[#allocation8 + $0x520] ss:$16 sps:$4 sm:$0xff]   ;;  %v5017_v4 = vld [vmem:[#allocation8 + $0x128] ss:$16 sps:$4 sm:$0xff]  }
  0xa4   :  { %1474 = vmatprep.subr.bf16.mxu1 %v4935_v5  ;;  %v5022_v5 = vld [vmem:[#allocation8 + $0x504] ss:$16 sps:$4 sm:$0xff]  }
  0xa5   :  { %1384 = vmatmul.mubr.bf16.vlgmr.msra.gmra.mxu0 %v5998_v6 }
  0xa6   :  { %1425 = vmatmul.mubr.bf16.vlgmr.msra.gmra.mxu1 %v6000_v7  ;;  %1434 = vmatpush1.bf16.msra.mxu0 %v4930_v8  ;;  %v5025_v8 = vld [vmem:[#allocation8 + $0x10c] ss:$16 sps:$4 sm:$0xff]  }
  0xa7   :  { %1475 = vmatpush1.bf16.msra.mxu1 %v4933_v9  ;;  %1435 = vmatprep.subr.bf16.mxu0 %v4938_v10  ;;  %v5020_v9 = vld [vmem:[#allocation8 + $0x500] ss:$16 sps:$4 sm:$0xff]   ;;  %v5023_v10 = vld [vmem:[#allocation8 + $0x108] ss:$16 sps:$4 sm:$0xff]  }
  0xa8   :  { %1476 = vmatprep.subr.bf16.mxu1 %v4941_v11  ;;  %1506 = vmatprep.mubr.bf16.mxu1 %v5992_v47  ;;  %v4987_v47 = vld [vmem:[#allocation8 + $0x1c8] ss:$16 sps:$4 sm:$0xff]   ;;  %v5030_v11 = vld [vmem:[#allocation8 + $0x2ec] ss:$16 sps:$4 sm:$0xff]  }
  0xa9   :  { %1465 = vmatprep.mubr.bf16.mxu0 %v6009_v34 }
  0xaa   :  { %1436 = vmatpush1.bf16.msra.mxu0 %v4936_v12  ;;  %v5033_v12 = vld [vmem:[#allocation8 + $0x4ec] ss:$16 sps:$4 sm:$0xff]  }
  0xab   :  { %1477 = vmatpush1.bf16.msra.mxu1 %v4939_v13  ;;  %1437 = vmatprep.subr.bf16.mxu0 %v4944_v14  ;;  %v6014_v13 = vcombine.low %v6005_v32, %v6005_v32  ;;  %v5028_v14 = vld [vmem:[#allocation8 + $0x2e8] ss:$16 sps:$4 sm:$0xff]  }
  0xac   :  { %1478 = vmatprep.subr.bf16.mxu1 %v4947_v15  ;;  %v5031_v15 = vld [vmem:[#allocation8 + $0x4e8] ss:$16 sps:$4 sm:$0xff]  }
  0xad   :  { %v5058_v32 = vld [vmem:[#allocation8 + $0x248] ss:$16 sps:$4 sm:$0xff]  }
  0xae   :  { %1438 = vmatpush1.bf16.msra.mxu0 %v4942_v16  ;;  %v5036_v16 = vld [vmem:[#allocation8 + $0x2cc] ss:$16 sps:$4 sm:$0xff]  }
  0xaf   :  { %1479 = vmatpush1.bf16.msra.mxu1 %v4945_v17  ;;  %1439 = vmatprep.subr.bf16.mxu0 %v4950_v18  ;;  %v5039_v17 = vld [vmem:[#allocation8 + $0x4cc] ss:$16 sps:$4 sm:$0xff]   ;;  %v5034_v18 = vld [vmem:[#allocation8 + $0x2c8] ss:$16 sps:$4 sm:$0xff]  }
  0xb0   :  { %1480 = vmatprep.subr.bf16.mxu1 %v4953_v19  ;;  %v5037_v19 = vld [vmem:[#allocation8 + $0x4c8] ss:$16 sps:$4 sm:$0xff]  }
  0xb2   :  { %1440 = vmatpush1.bf16.msra.mxu0 %v4948_v20  ;;  %v5042_v20 = vld [vmem:[#allocation8 + $0x2ac] ss:$16 sps:$4 sm:$0xff]  }
  0xb3   :  { %1481 = vmatpush1.bf16.msra.mxu1 %v4951_v21  ;;  %1441 = vmatprep.subr.bf16.mxu0 %v4956_v22  ;;  %v5045_v21 = vld [vmem:[#allocation8 + $0x4ac] ss:$16 sps:$4 sm:$0xff]   ;;  %v5040_v22 = vld [vmem:[#allocation8 + $0x2a8] ss:$16 sps:$4 sm:$0xff]  }
  0xb4   :  { %1482 = vmatprep.subr.bf16.mxu1 %v4959_v23  ;;  %v5043_v23 = vld [vmem:[#allocation8 + $0x4a8] ss:$16 sps:$4 sm:$0xff]  }
  0xb6   :  { %1442 = vmatpush1.bf16.msra.mxu0 %v4954_v24  ;;  %v5048_v24 = vld [vmem:[#allocation8 + $0x28c] ss:$16 sps:$4 sm:$0xff]  }
  0xb7   :  { %1483 = vmatpush1.bf16.msra.mxu1 %v4957_v25  ;;  %1443 = vmatprep.subr.bf16.mxu0 %v4962_v26  ;;  %v5046_v25 = vld [vmem:[#allocation8 + $0x288] ss:$16 sps:$4 sm:$0xff]  }
  0xb8   :  { %1484 = vmatprep.subr.bf16.mxu1 %v4965_v27  ;;  %v5049_v26 = vld [vmem:[#allocation8 + $0x488] ss:$16 sps:$4 sm:$0xff]   ;;  %v5054_v27 = vld [vmem:[#allocation8 + $0x26c] ss:$16 sps:$4 sm:$0xff]  }
  0xba   :  { %1444 = vmatpush1.bf16.msra.mxu0 %v4960_v28  ;;  %v5057_v28 = vld [vmem:[#allocation8 + $0x46c] ss:$16 sps:$4 sm:$0xff]  }
  0xbb   :  { %1485 = vmatpush1.bf16.msra.mxu1 %v4963_v29  ;;  %1445 = vmatprep.subr.bf16.mxu0 %v4968_v30  ;;  %v5052_v29 = vld [vmem:[#allocation8 + $0x268] ss:$16 sps:$4 sm:$0xff]   ;;  %v5060_v30 = vld [vmem:[#allocation8 + $0x24c] ss:$16 sps:$4 sm:$0xff]  }
  0xbc   :  { %1486 = vmatprep.subr.bf16.mxu1 %v4971_v31  ;;  %v5063_v31 = vld [vmem:[#allocation8 + $0x44c] ss:$16 sps:$4 sm:$0xff]  }
  0xbe   :  { %1446 = vmatpush1.bf16.msra.mxu0 %v4966_v33  ;;  %v5061_v33 = vld [vmem:[#allocation8 + $0x448] ss:$16 sps:$4 sm:$0xff]  }
  0xbf   :  { %1487 = vmatpush1.bf16.msra.mxu1 %v4969_v35  ;;  %1447 = vmatprep.subr.bf16.mxu0 %v4974_v36  ;;  %v5069_v35 = vld [vmem:[#allocation8 + $0x42c] ss:$16 sps:$4 sm:$0xff]   ;;  %v5064_v36 = vld [vmem:[#allocation8 + $0x228] ss:$16 sps:$4 sm:$0xff]  }
  0xc0   :  { %1488 = vmatprep.subr.bf16.mxu1 %v4977_v37  ;;  %v5067_v37 = vld [vmem:[#allocation8 + $0x428] ss:$16 sps:$4 sm:$0xff]  }
  0xc2   :  { %1448 = vmatpush1.bf16.msra.mxu0 %v4972_v38  ;;  %v5072_v38 = vld [vmem:[#allocation8 + $0x20c] ss:$16 sps:$4 sm:$0xff]  }
  0xc3   :  { %1489 = vmatpush1.bf16.msra.mxu1 %v4975_v39  ;;  %1449 = vmatprep.subr.bf16.mxu0 %v4980_v40  ;;  %v5075_v39 = vld [vmem:[#allocation8 + $0x40c] ss:$16 sps:$4 sm:$0xff]   ;;  %v5070_v40 = vld [vmem:[#allocation8 + $0x208] ss:$16 sps:$4 sm:$0xff]  }
  0xc4   :  { %1490 = vmatprep.subr.bf16.mxu1 %v4983_v41  ;;  %v5073_v41 = vld [vmem:[#allocation8 + $0x408] ss:$16 sps:$4 sm:$0xff]  }
  0xc6   :  { %1450 = vmatpush2.bf16.msra.mxu0 %v4978_v42  ;;  %v5078_v42 = vld [vmem:[#allocation8 + $0x3ec] ss:$16 sps:$4 sm:$0xff]  }
  0xc7   :  { %1491 = vmatpush2.bf16.msra.mxu1 %v4981_v43  ;;  %1451 = vmatprep.subr.bf16.mxu0 %v4986_v44  ;;  %v5081_v43 = vld [vmem:[#allocation8 + $0x5ec] ss:$16 sps:$4 sm:$0xff]   ;;  %v5076_v44 = vld [vmem:[#allocation8 + $0x3e8] ss:$16 sps:$4 sm:$0xff]  }
  0xc8   :  { %1492 = vmatprep.subr.bf16.mxu1 %v4989_v45  ;;  %v5079_v45 = vld [vmem:[#allocation8 + $0x5e8] ss:$16 sps:$4 sm:$0xff]  }
  0xca   :  { %1452 = vmatpush2.bf16.msra.mxu0 %v4984_v46  ;;  %v5084_v46 = vld [vmem:[#allocation8 + $0x3cc] ss:$16 sps:$4 sm:$0xff]  }
  0xcb   :  { %1493 = vmatpush2.bf16.msra.mxu1 %v4987_v47  ;;  %1453 = vmatprep.subr.bf16.mxu0 %v4992_v48  ;;  %v5087_v47 = vld [vmem:[#allocation8 + $0x5cc] ss:$16 sps:$4 sm:$0xff]   ;;  %v5082_v48 = vld [vmem:[#allocation8 + $0x3c8] ss:$16 sps:$4 sm:$0xff]  }
  0xcc   :  { %1494 = vmatprep.subr.bf16.mxu1 %v4995_v49  ;;  %v5085_v49 = vld [vmem:[#allocation8 + $0x5c8] ss:$16 sps:$4 sm:$0xff]  }
  0xce   :  { %1454 = vmatpush2.bf16.msra.mxu0 %v4990_v50  ;;  %v5090_v50 = vld [vmem:[#allocation8 + $0x3ac] ss:$16 sps:$4 sm:$0xff]  }
  0xcf   :  { %1495 = vmatpush2.bf16.msra.mxu1 %v4993_v52  ;;  %1455 = vmatprep.subr.bf16.mxu0 %v4998_v53  ;;  %v5093_v52 = vld [vmem:[#allocation8 + $0x5ac] ss:$16 sps:$4 sm:$0xff]   ;;  %v5088_v53 = vld [vmem:[#allocation8 + $0x3a8] ss:$16 sps:$4 sm:$0xff]  }
  0xd0   :  { %1496 = vmatprep.subr.bf16.mxu1 %v5001_v54  ;;  %v5091_v54 = vld [vmem:[#allocation8 + $0x5a8] ss:$16 sps:$4 sm:$0xff]  }
  0xd2   :  { %1456 = vmatpush2.bf16.msra.mxu0 %v4996_v55  ;;  %v5096_v55 = vld [vmem:[#allocation8 + $0x38c] ss:$16 sps:$4 sm:$0xff]  }
  0xd3   :  { %1497 = vmatpush2.bf16.msra.mxu1 %v4999_v56  ;;  %1457 = vmatprep.subr.bf16.mxu0 %v5004_v57  ;;  %v5099_v56 = vld [vmem:[#allocation8 + $0x58c] ss:$16 sps:$4 sm:$0xff]   ;;  %v5094_v57 = vld [vmem:[#allocation8 + $0x388] ss:$16 sps:$4 sm:$0xff]  }
  0xd4   :  { %1498 = vmatprep.subr.bf16.mxu1 %v5007_v58  ;;  %v5097_v58 = vld [vmem:[#allocation8 + $0x588] ss:$16 sps:$4 sm:$0xff]  }
  0xd6   :  { %1458 = vmatpush2.bf16.msra.mxu0 %v5002_v59  ;;  %v5102_v59 = vld [vmem:[#allocation8 + $0x36c] ss:$16 sps:$4 sm:$0xff]  }
  0xd7   :  { %1499 = vmatpush2.bf16.msra.mxu1 %v5005_v60  ;;  %1459 = vmatprep.subr.bf16.mxu0 %v5010_v61  ;;  %v5105_v60 = vld [vmem:[#allocation8 + $0x56c] ss:$16 sps:$4 sm:$0xff]   ;;  %v5100_v61 = vld [vmem:[#allocation8 + $0x368] ss:$16 sps:$4 sm:$0xff]  }
  0xd8   :  { %1500 = vmatprep.subr.bf16.mxu1 %v5013_v62  ;;  %v5103_v62 = vld [vmem:[#allocation8 + $0x568] ss:$16 sps:$4 sm:$0xff]  }
  0xda   :  { %1460 = vmatpush2.bf16.msra.mxu0 %v5008_v63  ;;  %v5108_v63 = vld [vmem:[#allocation8 + $0x34c] ss:$16 sps:$4 sm:$0xff]  }
  0xdb   :  { %1501 = vmatpush2.bf16.msra.mxu1 %v5011_v0  ;;  %1461 = vmatprep.subr.bf16.mxu0 %v5016_v1  ;;  %v5111_v0 = vld [vmem:[#allocation8 + $0x54c] ss:$16 sps:$4 sm:$0xff]   ;;  %v5106_v1 = vld [vmem:[#allocation8 + $0x348] ss:$16 sps:$4 sm:$0xff]  }
  0xdc   :  { %1502 = vmatprep.subr.bf16.mxu1 %v5019_v2  ;;  %v5109_v2 = vld [vmem:[#allocation8 + $0x548] ss:$16 sps:$4 sm:$0xff]  }
  0xde   :  { %1462 = vmatpush2.bf16.msra.mxu0 %v5014_v3  ;;  %v5114_v3 = vld [vmem:[#allocation8 + $0x32c] ss:$16 sps:$4 sm:$0xff]  }
  0xdf   :  { %1503 = vmatpush2.bf16.msra.mxu1 %v5017_v4  ;;  %1463 = vmatprep.subr.bf16.mxu0 %v5022_v5  ;;  %v5117_v4 = vld [vmem:[#allocation8 + $0x52c] ss:$16 sps:$4 sm:$0xff]   ;;  %v5112_v5 = vld [vmem:[#allocation8 + $0x328] ss:$16 sps:$4 sm:$0xff]  }
  0xe0   :  { %1504 = vmatprep.subr.bf16.mxu1 %v5025_v8  ;;  %v5115_v8 = vld [vmem:[#allocation8 + $0x528] ss:$16 sps:$4 sm:$0xff]  }
  0xe2   :  { %1464 = vmatpush2.bf16.msra.mxu0 %v5020_v9  ;;  %v5120_v9 = vld [vmem:[#allocation8 + $0x30c] ss:$16 sps:$4 sm:$0xff]  }
  0xe3   :  { %1505 = vmatpush2.bf16.msra.mxu1 %v5023_v10  ;;  %1515 = vmatprep.subr.bf16.mxu0 %v5030_v11  ;;  %v5123_v10 = vld [vmem:[#allocation8 + $0x50c] ss:$16 sps:$4 sm:$0xff]   ;;  %v5118_v11 = vld [vmem:[#allocation8 + $0x308] ss:$16 sps:$4 sm:$0xff]  }
  0xe4   :  { %1556 = vmatprep.subr.bf16.mxu1 %v5033_v12  ;;  %v5121_v12 = vld [vmem:[#allocation8 + $0x508] ss:$16 sps:$4 sm:$0xff]  }
  0xe5   :  { %1466 = vmatmul.mubr.bf16.vlgmr.msra.gmra.mxu0 %v6014_v13 }
  0xe6   :  { %1507 = vmatmul.mubr.bf16.vlgmr.msra.gmra.mxu1 %v5998_v6  ;;  %1516 = vmatpush1.bf16.msra.mxu0 %v5028_v14  ;;  %v5051_v6 = vld [vmem:[#allocation8 + $0x48c] ss:$16 sps:$4 sm:$0xff]   ;;  %v5126_v14 = vld [vmem:[#allocation10 + $0xe4] ss:$16 sps:$4 sm:$0xff]  }
  0xe7   :  { %1557 = vmatpush1.bf16.msra.mxu1 %v5031_v15  ;;  %1517 = vmatprep.subr.bf16.mxu0 %v5036_v16  ;;  %v5129_v15 = vld [vmem:[#allocation10 + $0x2e4] ss:$16 sps:$4 sm:$0xff]   ;;  %v6020_v16 = vld [vmem:[#allocation5] sm:$0xff] }
  0xe8   :  { %1558 = vmatprep.subr.bf16.mxu1 %v5039_v17  ;;  %1547 = vmatprep.mubr.bf16.mxu0 %v5994_v51  ;;  %v5055_v51 = vld [vmem:[#allocation8 + $0x468] ss:$16 sps:$4 sm:$0xff]   ;;  %v6022_v17 = vld [vmem:[#allocation5 + $0x8] sm:$0xff] }
  0xe9   :  { %1588 = vmatprep.mubr.bf16.mxu1 %v6009_v34  ;;  %v5066_v34 = vld [vmem:[#allocation8 + $0x22c] ss:$16 sps:$4 sm:$0xff]  }
  0xea   :  { %1518 = vmatpush1.bf16.msra.mxu0 %v5034_v18  ;;  %v5124_v18 = vld [vmem:[#allocation10 + $0xe0] ss:$16 sps:$4 sm:$0xff]  }
  0xeb   :  { %1559 = vmatpush1.bf16.msra.mxu1 %v5037_v19  ;;  %1519 = vmatprep.subr.bf16.mxu0 %v5042_v20  ;;  %v5127_v19 = vld [vmem:[#allocation10 + $0x2e0] ss:$16 sps:$4 sm:$0xff]   ;;  %v5132_v20 = vld [vmem:[#allocation10 + $0xc4] ss:$16 sps:$4 sm:$0xff]  }
  0xec   :  { %1560 = vmatprep.subr.bf16.mxu1 %v5045_v21  ;;  %v5135_v21 = vld [vmem:[#allocation10 + $0x2c4] ss:$16 sps:$4 sm:$0xff]  }
  0xee   :  { %1520 = vmatpush1.bf16.msra.mxu0 %v5040_v22  ;;  %v6026_v22 = vcombine.high %v6020_v16, %v6020_v16 }
  0xef   :  { %1561 = vmatpush1.bf16.msra.mxu1 %v5043_v23  ;;  %1521 = vmatprep.subr.bf16.mxu0 %v5048_v24  ;;  %v6030_v23 = vcombine.high %v6022_v17, %v6022_v17  ;;  %v5130_v24 = vld [vmem:[#allocation10 + $0xc0] ss:$16 sps:$4 sm:$0xff]  }
  0xf0   :  { %1562 = vmatprep.subr.bf16.mxu1 %v5051_v6  ;;  %v5133_v6 = vld [vmem:[#allocation10 + $0x2c0] ss:$16 sps:$4 sm:$0xff]  }
  0xf2   :  { %1522 = vmatpush1.bf16.msra.mxu0 %v5046_v25  ;;  %v5138_v25 = vld [vmem:[#allocation10 + $0xa4] ss:$16 sps:$4 sm:$0xff]  }
  0xf3   :  { %1563 = vmatpush1.bf16.msra.mxu1 %v5049_v26  ;;  %1523 = vmatprep.subr.bf16.mxu0 %v5054_v27  ;;  %v5141_v26 = vld [vmem:[#allocation10 + $0x2a4] ss:$16 sps:$4 sm:$0xff]   ;;  %v5136_v27 = vld [vmem:[#allocation10 + $0xa0] ss:$16 sps:$4 sm:$0xff]  }
  0xf4   :  { %1564 = vmatprep.subr.bf16.mxu1 %v5057_v28  ;;  %v5139_v28 = vld [vmem:[#allocation10 + $0x2a0] ss:$16 sps:$4 sm:$0xff]  }
  0xf6   :  { %1524 = vmatpush1.bf16.msra.mxu0 %v5052_v29  ;;  %v5142_v29 = vld [vmem:[#allocation10 + $0x80] ss:$16 sps:$4 sm:$0xff]  }
  0xf7   :  { %1565 = vmatpush1.bf16.msra.mxu1 %v5055_v51  ;;  %1525 = vmatprep.subr.bf16.mxu0 %v5060_v30  ;;  %v5145_v51 = vld [vmem:[#allocation10 + $0x280] ss:$16 sps:$4 sm:$0xff]   ;;  %v5150_v30 = vld [vmem:[#allocation10 + $0x64] ss:$16 sps:$4 sm:$0xff]  }
  0xf8   :  { %1566 = vmatprep.subr.bf16.mxu1 %v5063_v31  ;;  %v5153_v31 = vld [vmem:[#allocation10 + $0x264] ss:$16 sps:$4 sm:$0xff]  }
  0xfa   :  { %1526 = vmatpush1.bf16.msra.mxu0 %v5058_v32  ;;  %v5148_v32 = vld [vmem:[#allocation10 + $0x60] ss:$16 sps:$4 sm:$0xff]  }
  0xfb   :  { %1567 = vmatpush1.bf16.msra.mxu1 %v5061_v33  ;;  %1527 = vmatprep.subr.bf16.mxu0 %v5066_v34  ;;  %v5151_v33 = vld [vmem:[#allocation10 + $0x260] ss:$16 sps:$4 sm:$0xff]   ;;  %v5156_v34 = vld [vmem:[#allocation10 + $0x44] ss:$16 sps:$4 sm:$0xff]  }
  0xfc   :  { %1568 = vmatprep.subr.bf16.mxu1 %v5069_v35  ;;  %v5159_v35 = vld [vmem:[#allocation10 + $0x244] ss:$16 sps:$4 sm:$0xff]  }
  0xfe   :  { %1528 = vmatpush1.bf16.msra.mxu0 %v5064_v36  ;;  %v5154_v36 = vld [vmem:[#allocation10 + $0x40] ss:$16 sps:$4 sm:$0xff]  }
  0xff   :  { %1569 = vmatpush1.bf16.msra.mxu1 %v5067_v37  ;;  %1529 = vmatprep.subr.bf16.mxu0 %v5072_v38  ;;  %v5157_v37 = vld [vmem:[#allocation10 + $0x240] ss:$16 sps:$4 sm:$0xff]   ;;  %v5162_v38 = vld [vmem:[#allocation10 + $0x24] ss:$16 sps:$4 sm:$0xff]  }
 0x100   :  { %1570 = vmatprep.subr.bf16.mxu1 %v5075_v39  ;;  %v5165_v39 = vld [vmem:[#allocation10 + $0x224] ss:$16 sps:$4 sm:$0xff]  }
 0x102   :  { %1530 = vmatpush1.bf16.msra.mxu0 %v5070_v40  ;;  %v5160_v40 = vld [vmem:[#allocation10 + $0x20] ss:$16 sps:$4 sm:$0xff]  }
 0x103   :  { %1571 = vmatpush1.bf16.msra.mxu1 %v5073_v41  ;;  %1531 = vmatprep.subr.bf16.mxu0 %v5078_v42  ;;  %v5163_v41 = vld [vmem:[#allocation10 + $0x220] ss:$16 sps:$4 sm:$0xff]   ;;  %v5168_v42 = vld [vmem:[#allocation10 + $0x4] ss:$16 sps:$4 sm:$0xff]  }
 0x104   :  { %1572 = vmatprep.subr.bf16.mxu1 %v5081_v43  ;;  %v5171_v43 = vld [vmem:[#allocation10 + $0x204] ss:$16 sps:$4 sm:$0xff]  }
 0x106   :  { %1532 = vmatpush2.bf16.msra.mxu0 %v5076_v44  ;;  %v5166_v44 = vld [vmem:[#allocation10] ss:$16 sps:$4 sm:$0xff]  }
 0x107   :  { %1573 = vmatpush2.bf16.msra.mxu1 %v5079_v45  ;;  %1533 = vmatprep.subr.bf16.mxu0 %v5084_v46  ;;  %v5169_v45 = vld [vmem:[#allocation10 + $0x200] ss:$16 sps:$4 sm:$0xff]   ;;  %v5174_v46 = vld [vmem:[#allocation10 + $0x1e4] ss:$16 sps:$4 sm:$0xff]  }
 0x108   :  { %1574 = vmatprep.subr.bf16.mxu1 %v5087_v47  ;;  %v5177_v47 = vld [vmem:[#allocation10 + $0x3e4] ss:$16 sps:$4 sm:$0xff]  }
 0x10a   :  { %1534 = vmatpush2.bf16.msra.mxu0 %v5082_v48  ;;  %v5172_v48 = vld [vmem:[#allocation10 + $0x1e0] ss:$16 sps:$4 sm:$0xff]  }
 0x10b   :  { %1575 = vmatpush2.bf16.msra.mxu1 %v5085_v49  ;;  %1535 = vmatprep.subr.bf16.mxu0 %v5090_v50  ;;  %v5175_v49 = vld [vmem:[#allocation10 + $0x3e0] ss:$16 sps:$4 sm:$0xff]   ;;  %v5180_v50 = vld [vmem:[#allocation10 + $0x1c4] ss:$16 sps:$4 sm:$0xff]  }
 0x10c   :  { %1576 = vmatprep.subr.bf16.mxu1 %v5093_v52  ;;  %v5183_v52 = vld [vmem:[#allocation10 + $0x3c4] ss:$16 sps:$4 sm:$0xff]  }
 0x10e   :  { %1536 = vmatpush2.bf16.msra.mxu0 %v5088_v53  ;;  %v5178_v53 = vld [vmem:[#allocation10 + $0x1c0] ss:$16 sps:$4 sm:$0xff]  }
 0x10f   :  { %1577 = vmatpush2.bf16.msra.mxu1 %v5091_v54  ;;  %1537 = vmatprep.subr.bf16.mxu0 %v5096_v55  ;;  %v5181_v54 = vld [vmem:[#allocation10 + $0x3c0] ss:$16 sps:$4 sm:$0xff]   ;;  %v5186_v55 = vld [vmem:[#allocation10 + $0x1a4] ss:$16 sps:$4 sm:$0xff]  }
 0x110   :  { %1578 = vmatprep.subr.bf16.mxu1 %v5099_v56  ;;  %v5189_v56 = vld [vmem:[#allocation10 + $0x3a4] ss:$16 sps:$4 sm:$0xff]  }
 0x112   :  { %1538 = vmatpush2.bf16.msra.mxu0 %v5094_v57  ;;  %v5184_v57 = vld [vmem:[#allocation10 + $0x1a0] ss:$16 sps:$4 sm:$0xff]  }
 0x113   :  { %1579 = vmatpush2.bf16.msra.mxu1 %v5097_v58  ;;  %1539 = vmatprep.subr.bf16.mxu0 %v5102_v59  ;;  %v5187_v58 = vld [vmem:[#allocation10 + $0x3a0] ss:$16 sps:$4 sm:$0xff]   ;;  %v5192_v59 = vld [vmem:[#allocation10 + $0x184] ss:$16 sps:$4 sm:$0xff]  }
 0x114   :  { %1580 = vmatprep.subr.bf16.mxu1 %v5105_v60  ;;  %v5195_v60 = vld [vmem:[#allocation10 + $0x384] ss:$16 sps:$4 sm:$0xff]  }
 0x116   :  { %1540 = vmatpush2.bf16.msra.mxu0 %v5100_v61  ;;  %v5190_v61 = vld [vmem:[#allocation10 + $0x180] ss:$16 sps:$4 sm:$0xff]  }
 0x117   :  { %1581 = vmatpush2.bf16.msra.mxu1 %v5103_v62  ;;  %1541 = vmatprep.subr.bf16.mxu0 %v5108_v63  ;;  %v5193_v62 = vld [vmem:[#allocation10 + $0x380] ss:$16 sps:$4 sm:$0xff]   ;;  %v5198_v63 = vld [vmem:[#allocation10 + $0x164] ss:$16 sps:$4 sm:$0xff]  }
 0x118   :  { %1582 = vmatprep.subr.bf16.mxu1 %v5111_v0  ;;  %v5201_v0 = vld [vmem:[#allocation10 + $0x364] ss:$16 sps:$4 sm:$0xff]  }
 0x11a   :  { %1542 = vmatpush2.bf16.msra.mxu0 %v5106_v1  ;;  %v5196_v1 = vld [vmem:[#allocation10 + $0x160] ss:$16 sps:$4 sm:$0xff]  }
 0x11b   :  { %1583 = vmatpush2.bf16.msra.mxu1 %v5109_v2  ;;  %1543 = vmatprep.subr.bf16.mxu0 %v5114_v3  ;;  %v5199_v2 = vld [vmem:[#allocation10 + $0x360] ss:$16 sps:$4 sm:$0xff]   ;;  %v5204_v3 = vld [vmem:[#allocation10 + $0x144] ss:$16 sps:$4 sm:$0xff]  }
 0x11c   :  { %1584 = vmatprep.subr.bf16.mxu1 %v5117_v4  ;;  %v5207_v4 = vld [vmem:[#allocation10 + $0x344] ss:$16 sps:$4 sm:$0xff]  }
 0x11e   :  { %1544 = vmatpush2.bf16.msra.mxu0 %v5112_v5  ;;  %v5202_v5 = vld [vmem:[#allocation10 + $0x140] ss:$16 sps:$4 sm:$0xff]  }
 0x11f   :  { %1585 = vmatpush2.bf16.msra.mxu1 %v5115_v8  ;;  %1545 = vmatprep.subr.bf16.mxu0 %v5120_v9  ;;  %v5205_v8 = vld [vmem:[#allocation10 + $0x340] ss:$16 sps:$4 sm:$0xff]   ;;  %v5210_v9 = vld [vmem:[#allocation10 + $0x124] ss:$16 sps:$4 sm:$0xff]  }
 0x120   :  { %1586 = vmatprep.subr.bf16.mxu1 %v5123_v10  ;;  %v5213_v10 = vld [vmem:[#allocation10 + $0x324] ss:$16 sps:$4 sm:$0xff]  }
 0x122   :  { %1546 = vmatpush2.bf16.msra.mxu0 %v5118_v11  ;;  %v5208_v11 = vld [vmem:[#allocation10 + $0x120] ss:$16 sps:$4 sm:$0xff]  }
 0x123   :  { %1587 = vmatpush2.bf16.msra.mxu1 %v5121_v12  ;;  %2407 = vmatprep.subr.bf16.mxu0 %v5126_v14  ;;  %v5211_v12 = vld [vmem:[#allocation10 + $0x320] ss:$16 sps:$4 sm:$0xff]   ;;  %v5216_v14 = vld [vmem:[#allocation10 + $0x104] ss:$16 sps:$4 sm:$0xff]  }
 0x124   :  { %2448 = vmatprep.subr.bf16.mxu1 %v5129_v15  ;;  %v5219_v15 = vld [vmem:[#allocation10 + $0x304] ss:$16 sps:$4 sm:$0xff]  }
 0x125   :  { %1548 = vmatmul.mubr.bf16.vlgmr.msra.gmra.mxu0 %v6000_v7  ;;  %v5144_v7 = vld [vmem:[#allocation10 + $0x84] ss:$16 sps:$4 sm:$0xff]  }
 0x126   :  { %1589 = vmatmul.mubr.bf16.vlgmr.msra.gmra.mxu1 %v6014_v13  ;;  %2408 = vmatpush1.bf16.msra.mxu0 %v5124_v18  ;;  %v5147_v13 = vld [vmem:[#allocation10 + $0x284] ss:$16 sps:$4 sm:$0xff]   ;;  %v5214_v18 = vld [vmem:[#allocation10 + $0x100] ss:$16 sps:$4 sm:$0xff]  }
 0x127   :  { %2449 = vmatpush1.bf16.msra.mxu1 %v5127_v19  ;;  %2409 = vmatprep.subr.bf16.mxu0 %v5132_v20  ;;  %v5217_v19 = vld [vmem:[#allocation10 + $0x300] ss:$16 sps:$4 sm:$0xff]   ;;  %v5226_v20 = vld [vmem:[#allocation10 + $0xec] ss:$16 sps:$4 sm:$0xff]  }
 0x128   :  { %2450 = vmatprep.subr.bf16.mxu1 %v5135_v21  ;;  %2439 = vmatprep.mubr.bf16.mxu0 %v6026_v22  ;;  %v5229_v21 = vld [vmem:[#allocation10 + $0x2ec] ss:$16 sps:$4 sm:$0xff]  }
 0x129   :  { %2480 = vmatprep.mubr.bf16.mxu1 %v6030_v23 }
 0x12a   :  { %2410 = vmatpush1.bf16.msra.mxu0 %v5130_v24  ;;  %v5224_v24 = vld [vmem:[#allocation10 + $0xe8] ss:$16 sps:$4 sm:$0xff]  }
 0x12b   :  { %2451 = vmatpush1.bf16.msra.mxu1 %v5133_v6  ;;  %2411 = vmatprep.subr.bf16.mxu0 %v5138_v25  ;;  %v5227_v6 = vld [vmem:[#allocation10 + $0x2e8] ss:$16 sps:$4 sm:$0xff]   ;;  %v6038_v25 = vcombine.low %v6020_v16, %v6020_v16  ;;  %v5238_v16 = vld [vmem:[#allocation10 + $0xac] ss:$16 sps:$4 sm:$0xff]  }
 0x12c   :  { %2452 = vmatprep.subr.bf16.mxu1 %v5141_v26  ;;  %v6042_v26 = vcombine.low %v6022_v17, %v6022_v17 }
 0x12e   :  { %2412 = vmatpush1.bf16.msra.mxu0 %v5136_v27  ;;  %v5232_v27 = vld [vmem:[#allocation10 + $0xcc] ss:$16 sps:$4 sm:$0xff]  }
 0x12f   :  { %2453 = vmatpush1.bf16.msra.mxu1 %v5139_v28  ;;  %2413 = vmatprep.subr.bf16.mxu0 %v5144_v7  ;;  %v5235_v28 = vld [vmem:[#allocation10 + $0x2cc] ss:$16 sps:$4 sm:$0xff]   ;;  %v5230_v7 = vld [vmem:[#allocation10 + $0xc8] ss:$16 sps:$4 sm:$0xff]  }
 0x130   :  { %2454 = vmatprep.subr.bf16.mxu1 %v5147_v13  ;;  %v5233_v13 = vld [vmem:[#allocation10 + $0x2c8] ss:$16 sps:$4 sm:$0xff]  }
 0x132   :  { %2414 = vmatpush1.bf16.msra.mxu0 %v5142_v29 }
 0x133   :  { %2455 = vmatpush1.bf16.msra.mxu1 %v5145_v51  ;;  %2415 = vmatprep.subr.bf16.mxu0 %v5150_v30  ;;  %v5241_v30 = vld [vmem:[#allocation10 + $0x2ac] ss:$16 sps:$4 sm:$0xff]  }
 0x134   :  { %2456 = vmatprep.subr.bf16.mxu1 %v5153_v31 }
 0x136   :  { %2416 = vmatpush1.bf16.msra.mxu0 %v5148_v32  ;;  %v5236_v32 = vld [vmem:[#allocation10 + $0xa8] ss:$16 sps:$4 sm:$0xff]  }
 0x137   :  { %2457 = vmatpush1.bf16.msra.mxu1 %v5151_v33  ;;  %2417 = vmatprep.subr.bf16.mxu0 %v5156_v34  ;;  %v5239_v33 = vld [vmem:[#allocation10 + $0x2a8] ss:$16 sps:$4 sm:$0xff]  }
 0x138   :  { %2458 = vmatprep.subr.bf16.mxu1 %v5159_v35 }
 0x13a   :  { %2418 = vmatpush1.bf16.msra.mxu0 %v5154_v36  ;;  %v5244_v36 = vld [vmem:[#allocation10 + $0x8c] ss:$16 sps:$4 sm:$0xff]  }
 0x13b   :  { %2459 = vmatpush1.bf16.msra.mxu1 %v5157_v37  ;;  %2419 = vmatprep.subr.bf16.mxu0 %v5162_v38  ;;  %v5247_v37 = vld [vmem:[#allocation10 + $0x28c] ss:$16 sps:$4 sm:$0xff]  }
 0x13c   :  { %2460 = vmatprep.subr.bf16.mxu1 %v5165_v39 }
 0x13e   :  { %2420 = vmatpush1.bf16.msra.mxu0 %v5160_v40  ;;  %v5242_v40 = vld [vmem:[#allocation10 + $0x88] ss:$16 sps:$4 sm:$0xff]  }
 0x13f   :  { %2461 = vmatpush1.bf16.msra.mxu1 %v5163_v41  ;;  %2421 = vmatprep.subr.bf16.mxu0 %v5168_v42  ;;  %v5245_v41 = vld [vmem:[#allocation10 + $0x288] ss:$16 sps:$4 sm:$0xff]   ;;  %v5250_v42 = vld [vmem:[#allocation10 + $0x6c] ss:$16 sps:$4 sm:$0xff]  }
 0x140   :  { %2462 = vmatprep.subr.bf16.mxu1 %v5171_v43  ;;  %v5251_v43 = vld [vmem:[#allocation10 + $0x268] ss:$16 sps:$4 sm:$0xff]  }
 0x142   :  { %2422 = vmatpush1.bf16.msra.mxu0 %v5166_v44  ;;  %v5256_v44 = vld [vmem:[#allocation10 + $0x4c] ss:$16 sps:$4 sm:$0xff]  }
 0x143   :  { %2463 = vmatpush1.bf16.msra.mxu1 %v5169_v45  ;;  %2423 = vmatprep.subr.bf16.mxu0 %v5174_v46  ;;  %v5259_v45 = vld [vmem:[#allocation10 + $0x24c] ss:$16 sps:$4 sm:$0xff]   ;;  %v5254_v46 = vld [vmem:[#allocation10 + $0x48] ss:$16 sps:$4 sm:$0xff]  }
 0x144   :  { %2464 = vmatprep.subr.bf16.mxu1 %v5177_v47  ;;  %v5257_v47 = vld [vmem:[#allocation10 + $0x248] ss:$16 sps:$4 sm:$0xff]  }
 0x146   :  { %2424 = vmatpush2.bf16.msra.mxu0 %v5172_v48  ;;  %v5262_v48 = vld [vmem:[#allocation10 + $0x2c] ss:$16 sps:$4 sm:$0xff]  }
 0x147   :  { %2465 = vmatpush2.bf16.msra.mxu1 %v5175_v49  ;;  %2425 = vmatprep.subr.bf16.mxu0 %v5180_v50  ;;  %v5265_v49 = vld [vmem:[#allocation10 + $0x22c] ss:$16 sps:$4 sm:$0xff]   ;;  %v5260_v50 = vld [vmem:[#allocation10 + $0x28] ss:$16 sps:$4 sm:$0xff]  }
 0x148   :  { %2466 = vmatprep.subr.bf16.mxu1 %v5183_v52  ;;  %v5263_v52 = vld [vmem:[#allocation10 + $0x228] ss:$16 sps:$4 sm:$0xff]  }
 0x14a   :  { %2426 = vmatpush2.bf16.msra.mxu0 %v5178_v53  ;;  %v5268_v53 = vld [vmem:[#allocation10 + $0xc] ss:$16 sps:$4 sm:$0xff]  }
 0x14b   :  { %2467 = vmatpush2.bf16.msra.mxu1 %v5181_v54  ;;  %2427 = vmatprep.subr.bf16.mxu0 %v5186_v55  ;;  %v5271_v54 = vld [vmem:[#allocation10 + $0x20c] ss:$16 sps:$4 sm:$0xff]   ;;  %v5266_v55 = vld [vmem:[#allocation10 + $0x8] ss:$16 sps:$4 sm:$0xff]  }
 0x14c   :  { %2468 = vmatprep.subr.bf16.mxu1 %v5189_v56  ;;  %v5269_v56 = vld [vmem:[#allocation10 + $0x208] ss:$16 sps:$4 sm:$0xff]  }
 0x14e   :  { %2428 = vmatpush2.bf16.msra.mxu0 %v5184_v57  ;;  %v5274_v57 = vld [vmem:[#allocation10 + $0x1ec] ss:$16 sps:$4 sm:$0xff]  }
 0x14f   :  { %2469 = vmatpush2.bf16.msra.mxu1 %v5187_v58  ;;  %2429 = vmatprep.subr.bf16.mxu0 %v5192_v59  ;;  %v5277_v58 = vld [vmem:[#allocation10 + $0x3ec] ss:$16 sps:$4 sm:$0xff]   ;;  %v5272_v59 = vld [vmem:[#allocation10 + $0x1e8] ss:$16 sps:$4 sm:$0xff]  }
 0x150   :  { %2470 = vmatprep.subr.bf16.mxu1 %v5195_v60  ;;  %v5275_v60 = vld [vmem:[#allocation10 + $0x3e8] ss:$16 sps:$4 sm:$0xff]  }
 0x152   :  { %2430 = vmatpush2.bf16.msra.mxu0 %v5190_v61  ;;  %v5280_v61 = vld [vmem:[#allocation10 + $0x1cc] ss:$16 sps:$4 sm:$0xff]  }
 0x153   :  { %2471 = vmatpush2.bf16.msra.mxu1 %v5193_v62  ;;  %2431 = vmatprep.subr.bf16.mxu0 %v5198_v63  ;;  %v5283_v62 = vld [vmem:[#allocation10 + $0x3cc] ss:$16 sps:$4 sm:$0xff]   ;;  %v5278_v63 = vld [vmem:[#allocation10 + $0x1c8] ss:$16 sps:$4 sm:$0xff]  }
 0x154   :  { %2472 = vmatprep.subr.bf16.mxu1 %v5201_v0  ;;  %v5281_v0 = vld [vmem:[#allocation10 + $0x3c8] ss:$16 sps:$4 sm:$0xff]  }
 0x156   :  { %2432 = vmatpush2.bf16.msra.mxu0 %v5196_v1  ;;  %v5286_v1 = vld [vmem:[#allocation10 + $0x1ac] ss:$16 sps:$4 sm:$0xff]  }
 0x157   :  { %2473 = vmatpush2.bf16.msra.mxu1 %v5199_v2  ;;  %2433 = vmatprep.subr.bf16.mxu0 %v5204_v3  ;;  %v5289_v2 = vld [vmem:[#allocation10 + $0x3ac] ss:$16 sps:$4 sm:$0xff]   ;;  %v5284_v3 = vld [vmem:[#allocation10 + $0x1a8] ss:$16 sps:$4 sm:$0xff]  }
 0x158   :  { %2474 = vmatprep.subr.bf16.mxu1 %v5207_v4  ;;  %v5287_v4 = vld [vmem:[#allocation10 + $0x3a8] ss:$16 sps:$4 sm:$0xff]  }
 0x15a   :  { %2434 = vmatpush2.bf16.msra.mxu0 %v5202_v5  ;;  %v5292_v5 = vld [vmem:[#allocation10 + $0x18c] ss:$16 sps:$4 sm:$0xff]  }
 0x15b   :  { %2475 = vmatpush2.bf16.msra.mxu1 %v5205_v8  ;;  %2435 = vmatprep.subr.bf16.mxu0 %v5210_v9  ;;  %v5295_v8 = vld [vmem:[#allocation10 + $0x38c] ss:$16 sps:$4 sm:$0xff]   ;;  %v5290_v9 = vld [vmem:[#allocation10 + $0x188] ss:$16 sps:$4 sm:$0xff]  }
 0x15c   :  { %2476 = vmatprep.subr.bf16.mxu1 %v5213_v10  ;;  %v5293_v10 = vld [vmem:[#allocation10 + $0x388] ss:$16 sps:$4 sm:$0xff]  }
 0x15e   :  { %2436 = vmatpush2.bf16.msra.mxu0 %v5208_v11  ;;  %v5298_v11 = vld [vmem:[#allocation10 + $0x16c] ss:$16 sps:$4 sm:$0xff]  }
 0x15f   :  { %2477 = vmatpush2.bf16.msra.mxu1 %v5211_v12  ;;  %2437 = vmatprep.subr.bf16.mxu0 %v5216_v14  ;;  %v5301_v12 = vld [vmem:[#allocation10 + $0x36c] ss:$16 sps:$4 sm:$0xff]   ;;  %v350_v14 = vlaneseq }
 0x160   :  { %2478 = vmatprep.subr.bf16.mxu1 %v5219_v15  ;;  %v5296_v15 = vld [vmem:[#allocation10 + $0x168] ss:$16 sps:$4 sm:$0xff]  }
 0x162   :  { %2438 = vmatpush2.bf16.msra.mxu0 %v5214_v18  ;;  %v5299_v18 = vld [vmem:[#allocation10 + $0x368] ss:$16 sps:$4 sm:$0xff]  }
 0x163   :  { %2479 = vmatpush2.bf16.msra.mxu1 %v5217_v19  ;;  %2489 = vmatprep.subr.bf16.mxu0 %v5226_v20  ;;  %v5304_v19 = vld [vmem:[#allocation10 + $0x14c] ss:$16 sps:$4 sm:$0xff]  }
 0x164   :  { %2530 = vmatprep.subr.bf16.mxu1 %v5229_v21  ;;  %v5307_v20 = vld [vmem:[#allocation10 + $0x34c] ss:$16 sps:$4 sm:$0xff]   ;;  %v6056_v21 = vshrl.u32 %v350_v14, 7  ;;  %v5344_v14 = vld [vmem:[#allocation11 + $0x1e0] ss:$16 sps:$4 sm:$0xff]  }
 0x165   :  { %v6044_v29 = vpop.f32.mrf.mxu0  ;;  %2440 = vmatmul.mubr.bf16.vlgmr.msra.gmra.mxu0 %v6038_v25 }
 0x166   :  { %v6046_v51 = vpop.f32.mrf.mxu1  ;;  %2481 = vmatmul.mubr.bf16.vlgmr.msra.gmra.mxu1 %v6042_v26  ;;  %2490 = vmatpush1.bf16.msra.mxu0 %v5224_v24  ;;  %v5302_v24 = vld [vmem:[#allocation10 + $0x148] ss:$16 sps:$4 sm:$0xff]  }
 0x167   :  { %2531 = vmatpush1.bf16.msra.mxu1 %v5227_v6  ;;  %v6050_v17 = vpop.f32.mrf.mxu0  ;;  %2491 = vmatprep.subr.bf16.mxu0 %v5232_v27  ;;  %v5305_v6 = vld [vmem:[#allocation10 + $0x348] ss:$16 sps:$4 sm:$0xff]   ;;  %v5310_v27 = vld [vmem:[#allocation10 + $0x12c] ss:$16 sps:$4 sm:$0xff]  }
 0x168   :  { %v6052_v31 = vpop.f32.mrf.mxu1  ;;  %2532 = vmatprep.subr.bf16.mxu1 %v5235_v28  ;;  %2521 = vmatprep.mubr.bf16.mxu0 %v6026_v22  ;;  %v5253_v22 = vld [vmem:[#allocation10 + $0x26c] ss:$16 sps:$4 sm:$0xff]  }
 0x169   :  { %2562 = vmatprep.mubr.bf16.mxu1 %v6030_v23  ;;  %v1389_v34 = vpop.f32.mrf.mxu0  ;;  %v5248_v23 = vld [vmem:[#allocation10 + $0x68] ss:$16 sps:$4 sm:$0xff]   ;;  %v5313_v28 = vld [vmem:[#allocation10 + $0x32c] ss:$16 sps:$4 sm:$0xff]  }
 0x16a   :  { %v1430_v35 = vpop.f32.mrf.mxu1  ;;  %2492 = vmatpush1.bf16.msra.mxu0 %v5230_v7  ;;  %v6059_v7 = vsub.s32 0, %v6056_v21  ;;  %v5319_v34 = vld [vmem:[#allocation10 + $0x30c] ss:$16 sps:$4 sm:$0xff]  }
 0x16b   :  { %2533 = vmatpush1.bf16.msra.mxu1 %v5233_v13  ;;  %v1390_v38 = vpop.f32.mrf.mxu0  ;;  %2493 = vmatprep.subr.bf16.mxu0 %v5238_v16  ;;  %v6064_v13 = vld [vmem:[%s6144_s4] sm:$0xf]  ;;  %v6067_v16 = vsub.s32 1, %v6056_v21 }
 0x16c   :  { %v1431_v39 = vpop.f32.mrf.mxu1  ;;  %2534 = vmatprep.subr.bf16.mxu1 %v5241_v30  ;;  %v5308_v30 = vld [vmem:[#allocation10 + $0x128] ss:$16 sps:$4 sm:$0xff]   ;;  %v353_v35 = vrot.slane %v6064_v13, %v6059_v7 }
 0x16d   :  { %v5317_v38 = vld [vmem:[#allocation10 + $0x308] ss:$16 sps:$4 sm:$0xff]   ;;  %v5322_v39 = vld [vmem:[#allocation11 + $0xe4] ss:$16 sps:$4 sm:$0xff]  }
 0x16e   :  { %2494 = vmatpush1.bf16.msra.mxu0 %v5236_v32  ;;  %v5311_v32 = vld [vmem:[#allocation10 + $0x328] ss:$16 sps:$4 sm:$0xff]  }
 0x16f   :  { %2535 = vmatpush1.bf16.msra.mxu1 %v5239_v33  ;;  %2495 = vmatprep.subr.bf16.mxu0 %v5244_v36  ;;  %v5316_v33 = vld [vmem:[#allocation10 + $0x10c] ss:$16 sps:$4 sm:$0xff]   ;;  %v357_v36 = vrot.slane %v6064_v13, %v6067_v16 }
 0x170   :  { %2536 = vmatprep.subr.bf16.mxu1 %v5247_v37  ;;  %v5314_v37 = vld [vmem:[#allocation10 + $0x108] ss:$16 sps:$4 sm:$0xff]  }
 0x172   :  { %2496 = vmatpush1.bf16.msra.mxu0 %v5242_v40  ;;  %v1386_v40 = vadd.f32 %v6044_v29, %v353_v35  ;;  %v5323_v29 = vld [vmem:[#allocation11 + $0xc0] ss:$16 sps:$4 sm:$0xff]   ;;  %v5358_v35 = vld [vmem:[#allocation11 + $0x164] ss:$16 sps:$4 sm:$0xff]  }
 0x173   :  { %2537 = vmatpush1.bf16.msra.mxu1 %v5245_v41  ;;  %2497 = vmatprep.subr.bf16.mxu0 %v5250_v42  ;;  %v1388_v41 = vadd.f32 %v6050_v17, %v357_v36  ;;  %v5320_v42 = vld [vmem:[#allocation11 + $0xe0] ss:$16 sps:$4 sm:$0xff]  }
 0x174   :  { %2538 = vmatprep.subr.bf16.mxu1 %v5253_v22  ;;  %v5325_v22 = vld [vmem:[#allocation11 + $0xc4] ss:$16 sps:$4 sm:$0xff]   ;;  %v5422_v36 = vld [vmem:[#allocation11 + $0x3c0] ss:$16 sps:$4 sm:$0xff]  }
 0x176   :  { %2498 = vmatpush1.bf16.msra.mxu0 %v5248_v23  ;;  %v1427_v23 = vadd.f32 %v6046_v51, %v1386_v40  ;;  %v5428_v40 = vld [vmem:[#allocation11 + $0x3a0] ss:$16 sps:$4 sm:$0xff]  }
 0x177   :  { %2539 = vmatpush1.bf16.msra.mxu1 %v5251_v43  ;;  %2499 = vmatprep.subr.bf16.mxu0 %v5256_v44 }
 0x178   :  { %2540 = vmatprep.subr.bf16.mxu1 %v5259_v45  ;;  %v1429_v45 = vadd.f32 %v6052_v31, %v1388_v41  ;;  %v5370_v31 = vld [vmem:[#allocation11 + $0x2e4] ss:$16 sps:$4 sm:$0xff]  }
 0x179   :  { %v5430_v41 = vld [vmem:[#allocation11 + $0x3a4] ss:$16 sps:$4 sm:$0xff]  }
 0x17a   :  { %2500 = vmatpush1.bf16.msra.mxu0 %v5254_v46 }
 0x17b   :  { %2541 = vmatpush1.bf16.msra.mxu1 %v5257_v47  ;;  %2501 = vmatprep.subr.bf16.mxu0 %v5262_v48  ;;  %v5328_v48 = vld [vmem:[#allocation11 + $0xa4] ss:$16 sps:$4 sm:$0xff]  }
 0x17c   :  { %2542 = vmatprep.subr.bf16.mxu1 %v5265_v49 }
 0x17e   :  { %2502 = vmatpush1.bf16.msra.mxu0 %v5260_v50 }
 0x17f   :  { %2543 = vmatpush1.bf16.msra.mxu1 %v5263_v52  ;;  %2503 = vmatprep.subr.bf16.mxu0 %v5268_v53  ;;  %v5326_v52 = vld [vmem:[#allocation11 + $0xa0] ss:$16 sps:$4 sm:$0xff]  }
 0x180   :  { %2544 = vmatprep.subr.bf16.mxu1 %v5271_v54  ;;  %v5368_v54 = vld [vmem:[#allocation11 + $0x2e0] ss:$16 sps:$4 sm:$0xff]  }
 0x182   :  { %2504 = vmatpush1.bf16.msra.mxu0 %v5266_v55  ;;  %v5329_v55 = vld [vmem:[#allocation11 + $0x80] ss:$16 sps:$4 sm:$0xff]  }
 0x183   :  { %2545 = vmatpush1.bf16.msra.mxu1 %v5269_v56  ;;  %2505 = vmatprep.subr.bf16.mxu0 %v5274_v57  ;;  %v5334_v56 = vld [vmem:[#allocation11 + $0x64] ss:$16 sps:$4 sm:$0xff]   ;;  %v5374_v57 = vld [vmem:[#allocation11 + $0x2c0] ss:$16 sps:$4 sm:$0xff]  }
 0x184   :  { %2546 = vmatprep.subr.bf16.mxu1 %v5277_v58  ;;  %v5376_v58 = vld [vmem:[#allocation11 + $0x2c4] ss:$16 sps:$4 sm:$0xff]  }
 0x186   :  { %2506 = vmatpush2.bf16.msra.mxu0 %v5272_v59  ;;  %v5332_v59 = vld [vmem:[#allocation11 + $0x60] ss:$16 sps:$4 sm:$0xff]  }
 0x187   :  { %2547 = vmatpush2.bf16.msra.mxu1 %v5275_v60  ;;  %2507 = vmatprep.subr.bf16.mxu0 %v5280_v61  ;;  %v5337_v60 = vld [vmem:[#allocation11 + $0x44] ss:$16 sps:$4 sm:$0xff]   ;;  %v5380_v61 = vld [vmem:[#allocation11 + $0x2a0] ss:$16 sps:$4 sm:$0xff]  }
 0x188   :  { %2548 = vmatprep.subr.bf16.mxu1 %v5283_v62  ;;  %v5382_v62 = vld [vmem:[#allocation11 + $0x2a4] ss:$16 sps:$4 sm:$0xff]  }
 0x18a   :  { %2508 = vmatpush2.bf16.msra.mxu0 %v5278_v63  ;;  %v5335_v63 = vld [vmem:[#allocation11 + $0x40] ss:$16 sps:$4 sm:$0xff]  }
 0x18b   :  { %2549 = vmatpush2.bf16.msra.mxu1 %v5281_v0  ;;  %2509 = vmatprep.subr.bf16.mxu0 %v5286_v1  ;;  %v5340_v0 = vld [vmem:[#allocation11 + $0x24] ss:$16 sps:$4 sm:$0xff]   ;;  %v5386_v1 = vld [vmem:[#allocation11 + $0x280] ss:$16 sps:$4 sm:$0xff]  }
 0x18c   :  { %2550 = vmatprep.subr.bf16.mxu1 %v5289_v2  ;;  %v5388_v2 = vld [vmem:[#allocation11 + $0x284] ss:$16 sps:$4 sm:$0xff]  }
 0x18e   :  { %2510 = vmatpush2.bf16.msra.mxu0 %v5284_v3  ;;  %v5338_v3 = vld [vmem:[#allocation11 + $0x20] ss:$16 sps:$4 sm:$0xff]  }
 0x18f   :  { %2551 = vmatpush2.bf16.msra.mxu1 %v5287_v4  ;;  %2511 = vmatprep.subr.bf16.mxu0 %v5292_v5  ;;  %v5343_v4 = vld [vmem:[#allocation11 + $0x4] ss:$16 sps:$4 sm:$0xff]   ;;  %v5392_v5 = vld [vmem:[#allocation11 + $0x260] ss:$16 sps:$4 sm:$0xff]  }
 0x190   :  { %2552 = vmatprep.subr.bf16.mxu1 %v5295_v8  ;;  %v5394_v8 = vld [vmem:[#allocation11 + $0x264] ss:$16 sps:$4 sm:$0xff]  }
 0x192   :  { %2512 = vmatpush2.bf16.msra.mxu0 %v5290_v9  ;;  %v5341_v9 = vld [vmem:[#allocation11] ss:$16 sps:$4 sm:$0xff]  }
 0x193   :  { %2553 = vmatpush2.bf16.msra.mxu1 %v5293_v10  ;;  %2513 = vmatprep.subr.bf16.mxu0 %v5298_v11  ;;  %v5346_v10 = vld [vmem:[#allocation11 + $0x1e4] ss:$16 sps:$4 sm:$0xff]   ;;  %v5398_v11 = vld [vmem:[#allocation11 + $0x240] ss:$16 sps:$4 sm:$0xff]  }
 0x194   :  { %2554 = vmatprep.subr.bf16.mxu1 %v5301_v12  ;;  %v5400_v12 = vld [vmem:[#allocation11 + $0x244] ss:$16 sps:$4 sm:$0xff]  }
 0x196   :  { %2514 = vmatpush2.bf16.msra.mxu0 %v5296_v15  ;;  %v5349_v15 = vld [vmem:[#allocation11 + $0x1c4] ss:$16 sps:$4 sm:$0xff]  }
 0x197   :  { %2555 = vmatpush2.bf16.msra.mxu1 %v5299_v18  ;;  %2515 = vmatprep.subr.bf16.mxu0 %v5304_v19  ;;  %v5404_v18 = vld [vmem:[#allocation11 + $0x220] ss:$16 sps:$4 sm:$0xff]   ;;  %v5406_v19 = vld [vmem:[#allocation11 + $0x224] ss:$16 sps:$4 sm:$0xff]  }
 0x198   :  { %2556 = vmatprep.subr.bf16.mxu1 %v5307_v20  ;;  %v5347_v20 = vld [vmem:[#allocation11 + $0x1c0] ss:$16 sps:$4 sm:$0xff]  }
 0x19a   :  { %2516 = vmatpush2.bf16.msra.mxu0 %v5302_v24  ;;  %v5352_v24 = vld [vmem:[#allocation11 + $0x1a4] ss:$16 sps:$4 sm:$0xff]  }
 0x19b   :  { %2557 = vmatpush2.bf16.msra.mxu1 %v5305_v6  ;;  %2517 = vmatprep.subr.bf16.mxu0 %v5310_v27  ;;  %v5410_v6 = vld [vmem:[#allocation11 + $0x200] ss:$16 sps:$4 sm:$0xff]   ;;  %v5412_v27 = vld [vmem:[#allocation11 + $0x204] ss:$16 sps:$4 sm:$0xff]  }
 0x19c   :  { %2558 = vmatprep.subr.bf16.mxu1 %v5313_v28  ;;  %v5350_v28 = vld [vmem:[#allocation11 + $0x1a0] ss:$16 sps:$4 sm:$0xff]  }
 0x19e   :  { %2518 = vmatpush2.bf16.msra.mxu0 %v5308_v30  ;;  %v5355_v30 = vld [vmem:[#allocation11 + $0x184] ss:$16 sps:$4 sm:$0xff]  }
 0x19f   :  { %2559 = vmatpush2.bf16.msra.mxu1 %v5311_v32  ;;  %2519 = vmatprep.subr.bf16.mxu0 %v5316_v33  ;;  %v5416_v32 = vld [vmem:[#allocation11 + $0x3e0] ss:$16 sps:$4 sm:$0xff]   ;;  %v5418_v33 = vld [vmem:[#allocation11 + $0x3e4] ss:$16 sps:$4 sm:$0xff]  }
 0x1a0   :  { %2560 = vmatprep.subr.bf16.mxu1 %v5319_v34  ;;  %v5353_v34 = vld [vmem:[#allocation11 + $0x180] ss:$16 sps:$4 sm:$0xff]  }
 0x1a2   :  { %2520 = vmatpush2.bf16.msra.mxu0 %v5314_v37  ;;  %v5424_v37 = vld [vmem:[#allocation11 + $0x3c4] ss:$16 sps:$4 sm:$0xff]  }
 0x1a3   :  { %2561 = vmatpush2.bf16.msra.mxu1 %v5317_v38  ;;  %3365 = vmatprep.subr.bf16.mxu0 %v5322_v39  ;;  %v5356_v38 = vld [vmem:[#allocation11 + $0x160] ss:$16 sps:$4 sm:$0xff]   ;;  %v5361_v39 = vld [vmem:[#allocation11 + $0x144] ss:$16 sps:$4 sm:$0xff]  }
 0x1a4   :  { %3406 = vmatprep.subr.bf16.mxu1 %v5370_v31 }
 0x1a5   :  { %v1467_v43 = vpop.f32.mrf.mxu0  ;;  %2522 = vmatmul.mubr.bf16.vlgmr.msra.gmra.mxu0 %v6038_v25 }
 0x1a6   :  { %v6076_v44 = vpop.f32.mrf.mxu1  ;;  %2563 = vmatmul.mubr.bf16.vlgmr.msra.gmra.mxu1 %v6042_v26  ;;  %v1468_v46 = vadd.f32 %v1467_v43, %v1427_v23  ;;  %3366 = vmatpush1.bf16.msra.mxu0 %v5320_v42  ;;  %v5331_v26 = vld [vmem:[#allocation11 + $0x84] ss:$16 sps:$4 sm:$0xff]   ;;  %v5359_v42 = vld [vmem:[#allocation11 + $0x140] ss:$16 sps:$4 sm:$0xff]  }
 0x1a7   :  { %v1469_v17 = vpop.f32.mrf.mxu0  ;;  %3367 = vmatprep.subr.bf16.mxu0 %v5325_v22  ;;  %3407 = vmatpush1.bf16.msra.mxu1 %v5368_v54  ;;  %v5364_v22 = vld [vmem:[#allocation11 + $0x124] ss:$16 sps:$4 sm:$0xff]   ;;  %v5434_v23 = vld [vmem:[#allocation11 + $0x380] ss:$16 sps:$4 sm:$0xff]  }
 0x1a8   :  { %v6081_v47 = vpop.f32.mrf.mxu1  ;;  %1597 = vst [vmem:[#allocation19] sm:$0xff] %v1468_v46  ;;  %v1470_v49 = vadd.f32 %v1469_v17, %v1429_v45  ;;  %3408 = vmatprep.subr.bf16.mxu1 %v5376_v58  ;;  %v5436_v43 = vld [vmem:[#allocation11 + $0x384] ss:$16 sps:$4 sm:$0xff]   ;;  %v5362_v45 = vld [vmem:[#allocation11 + $0x120] ss:$16 sps:$4 sm:$0xff]  }
 0x1a9   :  { %v1471_v51 = vpop.f32.mrf.mxu0  ;;  %v5367_v46 = vld [vmem:[#allocation11 + $0x104] ss:$16 sps:$4 sm:$0xff]   ;;  %v5440_v17 = vld [vmem:[#allocation11 + $0x360] ss:$16 sps:$4 sm:$0xff]  }
 0x1aa   :  { %v1512_v50 = vpop.f32.mrf.mxu1  ;;  %1598 = vst [vmem:[#allocation19 + $0x8] sm:$0xff] %v1470_v49  ;;  %3368 = vmatpush1.bf16.msra.mxu0 %v5323_v29  ;;  %v6084_v29 = vsub.s32 2, %v6056_v21  ;;  %v6087_v49 = vsub.s32 3, %v6056_v21  ;;  %v5365_v51 = vld [vmem:[#allocation11 + $0x100] ss:$16 sps:$4 sm:$0xff]  }
 0x1ab   :  { %v1472_v25 = vpop.f32.mrf.mxu0  ;;  %3369 = vmatprep.subr.bf16.mxu0 %v5328_v48  ;;  %3409 = vmatpush1.bf16.msra.mxu1 %v5374_v57  ;;  %v5442_v48 = vld [vmem:[#allocation11 + $0x364] ss:$16 sps:$4 sm:$0xff]   ;;  %v5373_v50 = vld [vmem:[#allocation11 + $0xec] ss:$16 sps:$4 sm:$0xff]   ;;  %v5452_v58 = vld [vmem:[#allocation11 + $0x320] ss:$16 sps:$4 sm:$0xff]  }
 0x1ac   :  { %v1513_v53 = vpop.f32.mrf.mxu1  ;;  %3410 = vmatprep.subr.bf16.mxu1 %v5382_v62  ;;  %v5446_v25 = vld [vmem:[#allocation11 + $0x340] ss:$16 sps:$4 sm:$0xff]  }
 0x1ad   :  { %v5448_v53 = vld [vmem:[#allocation11 + $0x344] ss:$16 sps:$4 sm:$0xff]  }
 0x1ae   :  { %3370 = vmatpush1.bf16.msra.mxu0 %v5326_v52  ;;  %v361_v52 = vrot.slane %v6064_v13, %v6084_v29 }
 0x1af   :  { %3371 = vmatprep.subr.bf16.mxu0 %v5331_v26  ;;  %3411 = vmatpush1.bf16.msra.mxu1 %v5380_v61  ;;  %v365_v26 = vrot.slane %v6064_v13, %v6087_v49 }
 0x1b0   :  { %3412 = vmatprep.subr.bf16.mxu1 %v5388_v2  ;;  %v1509_v21 = vadd.f32 %v6076_v44, %v361_v52  ;;  %v5458_v2 = vld [vmem:[#allocation11 + $0x300] ss:$16 sps:$4 sm:$0xff]   ;;  %v5431_v52 = vld [vmem:[#allocation11 + $0x1a8] ss:$16 sps:$4 sm:$0xff]  }
 0x1b2   :  { %3372 = vmatpush1.bf16.msra.mxu0 %v5329_v55  ;;  %v5454_v55 = vld [vmem:[#allocation11 + $0x324] ss:$16 sps:$4 sm:$0xff]  }
 0x1b3   :  { %3373 = vmatprep.subr.bf16.mxu0 %v5334_v56  ;;  %3413 = vmatpush1.bf16.msra.mxu1 %v5386_v1  ;;  %v1511_v56 = vadd.f32 %v6081_v47, %v365_v26  ;;  %v5466_v47 = vld [vmem:[#allocation11 + $0x2ec] ss:$16 sps:$4 sm:$0xff]  }
 0x1b4   :  { %3414 = vmatprep.subr.bf16.mxu1 %v5394_v8  ;;  %v5445_v26 = vld [vmem:[#allocation11 + $0x16c] ss:$16 sps:$4 sm:$0xff]  }
 0x1b6   :  { %3374 = vmatpush1.bf16.msra.mxu0 %v5332_v59 }
 0x1b7   :  { %3375 = vmatprep.subr.bf16.mxu0 %v5337_v60  ;;  %3415 = vmatpush1.bf16.msra.mxu1 %v5392_v5 }
 0x1b8   :  { %3416 = vmatprep.subr.bf16.mxu1 %v5400_v12 }
 0x1ba   :  { %3376 = vmatpush1.bf16.msra.mxu0 %v5335_v63 }
 0x1bb   :  { %3377 = vmatprep.subr.bf16.mxu0 %v5340_v0  ;;  %3417 = vmatpush1.bf16.msra.mxu1 %v5398_v11  ;;  %v5460_v0 = vld [vmem:[#allocation11 + $0x304] ss:$16 sps:$4 sm:$0xff]  }
 0x1bc   :  { %3418 = vmatprep.subr.bf16.mxu1 %v5406_v19 }
 0x1be   :  { %3378 = vmatpush1.bf16.msra.mxu0 %v5338_v3 }
 0x1bf   :  { %3379 = vmatprep.subr.bf16.mxu0 %v5343_v4  ;;  %3419 = vmatpush1.bf16.msra.mxu1 %v5404_v18  ;;  %v6098_v4 = vld [vmem:[%s6146_s6] sm:$0xf] }
 0x1c0   :  { %3420 = vmatprep.subr.bf16.mxu1 %v5412_v27  ;;  %v1736_v5 = vrot.slane %v6098_v4, %v6059_v7  ;;  %v1740_v8 = vrot.slane %v6098_v4, %v6067_v16 }
 0x1c2   :  { %3380 = vmatpush1.bf16.msra.mxu0 %v5341_v9 }
 0x1c3   :  { %3381 = vmatprep.subr.bf16.mxu0 %v5346_v10  ;;  %3421 = vmatpush1.bf16.msra.mxu1 %v5410_v6 }
 0x1c4   :  { %3422 = vmatprep.subr.bf16.mxu1 %v5418_v33  ;;  %v5379_v33 = vld [vmem:[#allocation11 + $0xcc] ss:$16 sps:$4 sm:$0xff]  }
 0x1c6   :  { %3382 = vmatpush2.bf16.msra.mxu0 %v5344_v14 }
 0x1c7   :  { %3383 = vmatprep.subr.bf16.mxu0 %v5349_v15  ;;  %3423 = vmatpush2.bf16.msra.mxu1 %v5416_v32 }
 0x1c8   :  { %3424 = vmatprep.subr.bf16.mxu1 %v5424_v37  ;;  %v5391_v37 = vld [vmem:[#allocation11 + $0x8c] ss:$16 sps:$4 sm:$0xff]  }
 0x1ca   :  { %3384 = vmatpush2.bf16.msra.mxu0 %v5347_v20 }
 0x1cb   :  { %3385 = vmatprep.subr.bf16.mxu0 %v5352_v24  ;;  %3425 = vmatpush2.bf16.msra.mxu1 %v5422_v36  ;;  %v5383_v36 = vld [vmem:[#allocation11 + $0xa8] ss:$16 sps:$4 sm:$0xff]  }
 0x1cc   :  { %3426 = vmatprep.subr.bf16.mxu1 %v5430_v41  ;;  %v5403_v41 = vld [vmem:[#allocation11 + $0x4c] ss:$16 sps:$4 sm:$0xff]  }
 0x1ce   :  { %3386 = vmatpush2.bf16.msra.mxu0 %v5350_v28 }
 0x1cf   :  { %3387 = vmatprep.subr.bf16.mxu0 %v5355_v30  ;;  %3427 = vmatpush2.bf16.msra.mxu1 %v5428_v40  ;;  %v5371_v30 = vld [vmem:[#allocation11 + $0xe8] ss:$16 sps:$4 sm:$0xff]  }
 0x1d0   :  { %3428 = vmatprep.subr.bf16.mxu1 %v5436_v43  ;;  %v5395_v40 = vld [vmem:[#allocation11 + $0x68] ss:$16 sps:$4 sm:$0xff]   ;;  %v5415_v43 = vld [vmem:[#allocation11 + $0xc] ss:$16 sps:$4 sm:$0xff]  }
 0x1d2   :  { %3388 = vmatpush2.bf16.msra.mxu0 %v5353_v34  ;;  %v5377_v34 = vld [vmem:[#allocation11 + $0xc8] ss:$16 sps:$4 sm:$0xff]  }
 0x1d3   :  { %3389 = vmatprep.subr.bf16.mxu0 %v5358_v35  ;;  %3429 = vmatpush2.bf16.msra.mxu1 %v5434_v23  ;;  %v5385_v35 = vld [vmem:[#allocation11 + $0xac] ss:$16 sps:$4 sm:$0xff]   ;;  %v5407_v23 = vld [vmem:[#allocation11 + $0x28] ss:$16 sps:$4 sm:$0xff]  }
 0x1d4   :  { %3430 = vmatprep.subr.bf16.mxu1 %v5442_v48  ;;  %v5427_v48 = vld [vmem:[#allocation11 + $0x1cc] ss:$16 sps:$4 sm:$0xff]  }
 0x1d6   :  { %3390 = vmatpush2.bf16.msra.mxu0 %v5356_v38  ;;  %v5389_v38 = vld [vmem:[#allocation11 + $0x88] ss:$16 sps:$4 sm:$0xff]  }
 0x1d7   :  { %3391 = vmatprep.subr.bf16.mxu0 %v5361_v39  ;;  %3431 = vmatpush2.bf16.msra.mxu1 %v5440_v17  ;;  %v5397_v39 = vld [vmem:[#allocation11 + $0x6c] ss:$16 sps:$4 sm:$0xff]   ;;  %v5419_v17 = vld [vmem:[#allocation11 + $0x1e8] ss:$16 sps:$4 sm:$0xff]  }
 0x1d8   :  { %3432 = vmatprep.subr.bf16.mxu1 %v5448_v53  ;;  %v5437_v53 = vld [vmem:[#allocation11 + $0x188] ss:$16 sps:$4 sm:$0xff]  }
 0x1da   :  { %3392 = vmatpush2.bf16.msra.mxu0 %v5359_v42  ;;  %v5401_v42 = vld [vmem:[#allocation11 + $0x48] ss:$16 sps:$4 sm:$0xff]  }
 0x1db   :  { %3393 = vmatprep.subr.bf16.mxu0 %v5364_v22  ;;  %3433 = vmatpush2.bf16.msra.mxu1 %v5446_v25  ;;  %v5409_v22 = vld [vmem:[#allocation11 + $0x2c] ss:$16 sps:$4 sm:$0xff]  }
 0x1dc   :  { %3434 = vmatprep.subr.bf16.mxu1 %v5454_v55  ;;  %v5439_v25 = vld [vmem:[#allocation11 + $0x18c] ss:$16 sps:$4 sm:$0xff]  }
 0x1dd   :  { %v5457_v55 = vld [vmem:[#allocation11 + $0x12c] ss:$16 sps:$4 sm:$0xff]  }
 0x1de   :  { %3394 = vmatpush2.bf16.msra.mxu0 %v5362_v45  ;;  %v5413_v45 = vld [vmem:[#allocation11 + $0x8] ss:$16 sps:$4 sm:$0xff]  }
 0x1df   :  { %3395 = vmatprep.subr.bf16.mxu0 %v5367_v46  ;;  %3435 = vmatpush2.bf16.msra.mxu1 %v5452_v58  ;;  %v5421_v46 = vld [vmem:[#allocation11 + $0x1ec] ss:$16 sps:$4 sm:$0xff]   ;;  %v1748_v58 = vrot.slane %v6098_v4, %v6087_v49 }
 0x1e0   :  { %3436 = vmatprep.subr.bf16.mxu1 %v5460_v0 }
 0x1e2   :  { %3396 = vmatpush2.bf16.msra.mxu0 %v5365_v51  ;;  %v5425_v51 = vld [vmem:[#allocation11 + $0x1c8] ss:$16 sps:$4 sm:$0xff]  }
 0x1e3   :  { %3447 = vmatprep.subr.bf16.mxu0 %v5373_v50  ;;  %3437 = vmatpush2.bf16.msra.mxu1 %v5458_v2  ;;  %v5433_v50 = vld [vmem:[#allocation11 + $0x1ac] ss:$16 sps:$4 sm:$0xff]  }
 0x1e4   :  { %3488 = vmatprep.subr.bf16.mxu1 %v5466_v47 }
 0x1e5   :  { %v1549_v31 = vpop.f32.mrf.mxu0 }
 0x1e6   :  { %v1590_v54 = vpop.f32.mrf.mxu1  ;;  %v1550_v57 = vadd.f32 %v1549_v31, %v1509_v21  ;;  %v5443_v21 = vld [vmem:[#allocation11 + $0x168] ss:$16 sps:$4 sm:$0xff]   ;;  %v5451_v31 = vld [vmem:[#allocation11 + $0x14c] ss:$16 sps:$4 sm:$0xff]  }
 0x1e7   :  { %v1551_v59 = vpop.f32.mrf.mxu0 }
 0x1e8   :  { %v1592_v60 = vpop.f32.mrf.mxu1  ;;  %v1591_v61 = vadd.f32 %v1590_v54, %v1550_v57  ;;  %v1552_v62 = vadd.f32 %v1551_v59, %v1511_v56  ;;  %v5449_v54 = vld [vmem:[#allocation11 + $0x148] ss:$16 sps:$4 sm:$0xff]   ;;  %v1744_v56 = vrot.slane %v6098_v4, %v6084_v29 }
 0x1e9   :  { %v1553_v13 = vpop.f32.mrf.mxu0  ;;  %v5455_v57 = vld [vmem:[#allocation11 + $0x128] ss:$16 sps:$4 sm:$0xff]  }
 0x1ea   :  { %v1594_v63 = vpop.f32.mrf.mxu1  ;;  %1599 = vst [vmem:[#allocation19 + $0x10] sm:$0xff] %v1591_v61  ;;  %v1593_v1 = vadd.f32 %v1592_v60, %v1552_v62  ;;  %v5463_v61 = vld [vmem:[#allocation11 + $0x10c] ss:$16 sps:$4 sm:$0xff]   ;;  %v5464_v4 = vld [vmem:[#allocation11 + $0x2e8] ss:$16 sps:$4 sm:$0xff]  }
 0x1eb   :  { %v1554_v44 = vpop.f32.mrf.mxu0 }
 0x1ec   :  { %v1595_v3 = vpop.f32.mrf.mxu1  ;;  %1600 = vst [vmem:[#allocation19 + $0x18] sm:$0xff] %v1593_v1  ;;  %v5461_v1 = vld [vmem:[#allocation11 + $0x108] ss:$16 sps:$4 sm:$0xff]  }
 0x225   :  { %v2441_v9 = vpop.f32.mrf.mxu0 }
 0x226   :  { %v2482_v10 = vpop.f32.mrf.mxu1  ;;  %v2442_v11 = vadd.f32 %v2441_v9, %v1736_v5 }
 0x227   :  { %v2443_v12 = vpop.f32.mrf.mxu0 }
 0x228   :  { %v2484_v14 = vpop.f32.mrf.mxu1  ;;  %v2444_v15 = vadd.f32 %v2443_v12, %v1740_v8  ;;  %v2483_v18 = vadd.f32 %v2482_v10, %v2442_v11  ;;  %v5469_v11 = vld [vmem:[#allocation11 + $0x2cc] ss:$16 sps:$4 sm:$0xff]   ;;  %v5467_v12 = vld [vmem:[#allocation11 + $0x2c8] ss:$16 sps:$4 sm:$0xff]  }
 0x229   :  { %v2445_v19 = vpop.f32.mrf.mxu0 }
 0x22a   :  { %v2486_v20 = vpop.f32.mrf.mxu1  ;;  %v2485_v24 = vadd.f32 %v2484_v14, %v2444_v15  ;;  %v6104_v32 = vpack.c.bf16 %v2483_v18, %v2483_v18  ;;  %v5472_v14 = vld [vmem:[#allocation11 + $0x2ac] ss:$16 sps:$4 sm:$0xff]   ;;  %v5470_v15 = vld [vmem:[#allocation11 + $0x2a8] ss:$16 sps:$4 sm:$0xff]  }
 0x22b   :  { %v2446_v6 = vpop.f32.mrf.mxu0  ;;  %v5475_v18 = vld [vmem:[#allocation11 + $0x28c] ss:$16 sps:$4 sm:$0xff]   ;;  %v5512_v19 = vld [vmem:[#allocation13 + $0x70] ss:$8 sps:$4 sm:$0xff]  }
 0x22c   :  { %v2487_v27 = vpop.f32.mrf.mxu1  ;;  %v2572_v28 = vpack.c.bf16 %v2485_v24, %v2485_v24  ;;  %v5514_v20 = vld [vmem:[#allocation13 + $0x74] ss:$8 sps:$4 sm:$0xff]   ;;  %v5517_v24 = vld [vmem:[#allocation13 + $0x64] ss:$8 sps:$4 sm:$0xff]   ;;  %v5473_v6 = vld [vmem:[#allocation11 + $0x288] ss:$16 sps:$4 sm:$0xff]  }
 0x22d   :  { %v5515_v27 = vld [vmem:[#allocation13 + $0x60] ss:$8 sps:$4 sm:$0xff]  }
 0x22e   :  { %3397 = vmatprep.mubr.bf16.mxu0 %v2572_v28 }
 0x22f   :  { %3398 = vmatmul.mubr.bf16.vlgmr.msra.gmra.mxu0 %v6104_v32 }
 0x230   :  { %3448 = vmatpush1.bf16.msra.mxu0 %v5371_v30  ;;  %3479 = vmatprep.mubr.bf16.mxu0 %v2572_v28  ;;  %v5478_v28 = vld [vmem:[#allocation11 + $0x26c] ss:$16 sps:$4 sm:$0xff]  }
 0x231   :  { %3449 = vmatprep.subr.bf16.mxu0 %v5379_v33  ;;  %v5520_v30 = vld [vmem:[#allocation13 + $0x54] ss:$8 sps:$4 sm:$0xff]   ;;  %v5518_v33 = vld [vmem:[#allocation13 + $0x50] ss:$8 sps:$4 sm:$0xff]  }
 0x234   :  { %3450 = vmatpush1.bf16.msra.mxu0 %v5377_v34  ;;  %v5481_v34 = vld [vmem:[#allocation11 + $0x24c] ss:$16 sps:$4 sm:$0xff]  }
 0x235   :  { %3451 = vmatprep.subr.bf16.mxu0 %v5385_v35  ;;  %v5523_v35 = vld [vmem:[#allocation13 + $0x44] ss:$8 sps:$4 sm:$0xff]  }
 0x238   :  { %3452 = vmatpush1.bf16.msra.mxu0 %v5383_v36  ;;  %v5479_v36 = vld [vmem:[#allocation11 + $0x248] ss:$16 sps:$4 sm:$0xff]  }
 0x239   :  { %3453 = vmatprep.subr.bf16.mxu0 %v5391_v37  ;;  %v5521_v37 = vld [vmem:[#allocation13 + $0x40] ss:$8 sps:$4 sm:$0xff]  }
 0x23c   :  { %3454 = vmatpush1.bf16.msra.mxu0 %v5389_v38  ;;  %v5484_v38 = vld [vmem:[#allocation11 + $0x22c] ss:$16 sps:$4 sm:$0xff]  }
 0x23d   :  { %3455 = vmatprep.subr.bf16.mxu0 %v5397_v39  ;;  %v5526_v39 = vld [vmem:[#allocation13 + $0x34] ss:$8 sps:$4 sm:$0xff]  }
 0x240   :  { %3456 = vmatpush1.bf16.msra.mxu0 %v5395_v40  ;;  %v5482_v40 = vld [vmem:[#allocation11 + $0x228] ss:$16 sps:$4 sm:$0xff]  }
 0x241   :  { %3457 = vmatprep.subr.bf16.mxu0 %v5403_v41  ;;  %v5524_v41 = vld [vmem:[#allocation13 + $0x30] ss:$8 sps:$4 sm:$0xff]  }
 0x244   :  { %3458 = vmatpush1.bf16.msra.mxu0 %v5401_v42  ;;  %v5487_v42 = vld [vmem:[#allocation11 + $0x20c] ss:$16 sps:$4 sm:$0xff]  }
 0x245   :  { %3459 = vmatprep.subr.bf16.mxu0 %v5409_v22  ;;  %v5529_v22 = vld [vmem:[#allocation13 + $0x24] ss:$8 sps:$4 sm:$0xff]  }
 0x248   :  { %3460 = vmatpush1.bf16.msra.mxu0 %v5407_v23  ;;  %v5485_v23 = vld [vmem:[#allocation11 + $0x208] ss:$16 sps:$4 sm:$0xff]  }
 0x249   :  { %3461 = vmatprep.subr.bf16.mxu0 %v5415_v43  ;;  %v5527_v43 = vld [vmem:[#allocation13 + $0x20] ss:$8 sps:$4 sm:$0xff]  }
 0x24c   :  { %3462 = vmatpush1.bf16.msra.mxu0 %v5413_v45  ;;  %v5490_v45 = vld [vmem:[#allocation11 + $0x3ec] ss:$16 sps:$4 sm:$0xff]  }
 0x24d   :  { %3463 = vmatprep.subr.bf16.mxu0 %v5421_v46  ;;  %v5532_v46 = vld [vmem:[#allocation13 + $0x14] ss:$8 sps:$4 sm:$0xff]  }
 0x250   :  { %3464 = vmatpush2.bf16.msra.mxu0 %v5419_v17  ;;  %v5488_v17 = vld [vmem:[#allocation11 + $0x3e8] ss:$16 sps:$4 sm:$0xff]  }
 0x251   :  { %3465 = vmatprep.subr.bf16.mxu0 %v5427_v48  ;;  %v5530_v48 = vld [vmem:[#allocation13 + $0x10] ss:$8 sps:$4 sm:$0xff]  }
 0x254   :  { %3466 = vmatpush2.bf16.msra.mxu0 %v5425_v51  ;;  %v5493_v51 = vld [vmem:[#allocation11 + $0x3cc] ss:$16 sps:$4 sm:$0xff]  }
 0x255   :  { %3467 = vmatprep.subr.bf16.mxu0 %v5433_v50  ;;  %v5535_v50 = vld [vmem:[#allocation13 + $0x4] ss:$8 sps:$4 sm:$0xff]  }
 0x258   :  { %3468 = vmatpush2.bf16.msra.mxu0 %v5431_v52  ;;  %v5491_v52 = vld [vmem:[#allocation11 + $0x3c8] ss:$16 sps:$4 sm:$0xff]  }
 0x259   :  { %3469 = vmatprep.subr.bf16.mxu0 %v5439_v25  ;;  %v5533_v25 = vld [vmem:[#allocation13] ss:$8 sps:$4 sm:$0xff]  }
 0x25c   :  { %3470 = vmatpush2.bf16.msra.mxu0 %v5437_v53  ;;  %v5496_v53 = vld [vmem:[#allocation11 + $0x3ac] ss:$16 sps:$4 sm:$0xff]  }
 0x25d   :  { %3471 = vmatprep.subr.bf16.mxu0 %v5445_v26  ;;  %v5538_v26 = vld [vmem:[#allocation13 + $0xf4] ss:$8 sps:$4 sm:$0xff]  }
 0x260   :  { %3472 = vmatpush2.bf16.msra.mxu0 %v5443_v21  ;;  %v5494_v21 = vld [vmem:[#allocation11 + $0x3a8] ss:$16 sps:$4 sm:$0xff]  }
 0x261   :  { %3473 = vmatprep.subr.bf16.mxu0 %v5451_v31  ;;  %v5536_v31 = vld [vmem:[#allocation13 + $0xf0] ss:$8 sps:$4 sm:$0xff]  }
 0x264   :  { %3474 = vmatpush2.bf16.msra.mxu0 %v5449_v54  ;;  %v5499_v54 = vld [vmem:[#allocation11 + $0x38c] ss:$16 sps:$4 sm:$0xff]  }
 0x265   :  { %v2523_v59 = vpop.f32.mrf.mxu0  ;;  %3475 = vmatprep.subr.bf16.mxu0 %v5457_v55  ;;  %v5541_v55 = vld [vmem:[#allocation13 + $0xe4] ss:$8 sps:$4 sm:$0xff]  }
 0x266   :  { %v2564_v60 = vpop.f32.mrf.mxu1  ;;  %v2524_v62 = vadd.f32 %v2523_v59, %v1744_v56  ;;  %v5497_v56 = vld [vmem:[#allocation11 + $0x388] ss:$16 sps:$4 sm:$0xff]   ;;  %v5544_v59 = vld [vmem:[#allocation13 + $0xd4] ss:$8 sps:$4 sm:$0xff]  }
 0x267   :  { %v2525_v13 = vpop.f32.mrf.mxu0 }
 0x268   :  { %v2566_v63 = vpop.f32.mrf.mxu1  ;;  %v2526_v0 = vadd.f32 %v2525_v13, %v1748_v58  ;;  %3476 = vmatpush2.bf16.msra.mxu0 %v5455_v57  ;;  %v2565_v2 = vadd.f32 %v2564_v60, %v2524_v62  ;;  %v5539_v57 = vld [vmem:[#allocation13 + $0xe0] ss:$8 sps:$4 sm:$0xff]   ;;  %v5502_v58 = vld [vmem:[#allocation11 + $0x36c] ss:$16 sps:$4 sm:$0xff]  }
 0x269   :  { %v2527_v44 = vpop.f32.mrf.mxu0  ;;  %3477 = vmatprep.subr.bf16.mxu0 %v5463_v61  ;;  %v5500_v60 = vld [vmem:[#allocation11 + $0x368] ss:$16 sps:$4 sm:$0xff]   ;;  %v5505_v62 = vld [vmem:[#allocation11 + $0x34c] ss:$16 sps:$4 sm:$0xff]  }
 0x26a   :  { %v2568_v3 = vpop.f32.mrf.mxu1  ;;  %v2567_v47 = vadd.f32 %v2566_v63, %v2526_v0  ;;  %v6111_v10 = vpack.c.bf16 %v2565_v2, %v2565_v2  ;;  %v5542_v61 = vld [vmem:[#allocation13 + $0xd0] ss:$8 sps:$4 sm:$0xff]   ;;  %v5547_v13 = vld [vmem:[#allocation13 + $0xc4] ss:$8 sps:$4 sm:$0xff]   ;;  %v5545_v0 = vld [vmem:[#allocation13 + $0xc0] ss:$8 sps:$4 sm:$0xff]  }
 0x26b   :  { %v2528_v5 = vpop.f32.mrf.mxu0  ;;  %v5503_v63 = vld [vmem:[#allocation11 + $0x348] ss:$16 sps:$4 sm:$0xff]   ;;  %v5550_v2 = vld [vmem:[#allocation13 + $0xb4] ss:$8 sps:$4 sm:$0xff]  }
 0x26c   :  { %v2569_v8 = vpop.f32.mrf.mxu1  ;;  %v2574_v9 = vpack.c.bf16 %v2567_v47, %v2567_v47  ;;  %3478 = vmatpush2.bf16.msra.mxu0 %v5461_v1  ;;  %v5508_v1 = vld [vmem:[#allocation11 + $0x32c] ss:$16 sps:$4 sm:$0xff]   ;;  %v5506_v44 = vld [vmem:[#allocation11 + $0x328] ss:$16 sps:$4 sm:$0xff]  }
 0x26d   :  { %3933 = vmatprep.subr.bf16.mxu0 %v5514_v20  ;;  %v5548_v3 = vld [vmem:[#allocation13 + $0xb0] ss:$8 sps:$4 sm:$0xff]   ;;  %v5511_v47 = vld [vmem:[#allocation11 + $0x30c] ss:$16 sps:$4 sm:$0xff]   ;;  %v5563_v20 = vld [vmem:[#allocation13 + $0x160] ss:$8 sps:$4 sm:$0xff]  }
 0x26e   :  { %3438 = vmatprep.mubr.bf16.mxu1 %v2574_v9  ;;  %v5553_v5 = vld [vmem:[#allocation13 + $0xa4] ss:$8 sps:$4 sm:$0xff]   ;;  %v5509_v8 = vld [vmem:[#allocation11 + $0x308] ss:$16 sps:$4 sm:$0xff]  }
 0x26f   :  { %3480 = vmatmul.mubr.bf16.vlgmr.msra.gmra.mxu0 %v6104_v32  ;;  %3439 = vmatmul.mubr.bf16.vlgmr.msra.gmra.mxu1 %v6111_v10  ;;  %v5476_v32 = vld [vmem:[#allocation11 + $0x268] ss:$16 sps:$4 sm:$0xff]  }
 0x270   :  { %3489 = vmatpush1.bf16.msra.mxu1 %v5464_v4  ;;  %3520 = vmatprep.mubr.bf16.mxu1 %v2574_v9  ;;  %v5551_v9 = vld [vmem:[#allocation13 + $0xa0] ss:$8 sps:$4 sm:$0xff]   ;;  %v5556_v4 = vld [vmem:[#allocation13 + $0x94] ss:$8 sps:$4 sm:$0xff]  }
 0x271   :  { %3490 = vmatprep.subr.bf16.mxu1 %v5469_v11  ;;  %3934 = vmatpush1.bf16.msra.mxu0 %v5512_v19  ;;  %v5554_v11 = vld [vmem:[#allocation13 + $0x90] ss:$8 sps:$4 sm:$0xff]   ;;  %v5565_v19 = vld [vmem:[#allocation13 + $0x164] ss:$8 sps:$4 sm:$0xff]  }
 0x272   :  { %3935 = vmatprep.subr.bf16.mxu0 %v5517_v24  ;;  %v5568_v24 = vld [vmem:[#allocation13 + $0x154] ss:$8 sps:$4 sm:$0xff]  }
 0x274   :  { %3491 = vmatpush1.bf16.msra.mxu1 %v5467_v12  ;;  %v5559_v12 = vld [vmem:[#allocation13 + $0x84] ss:$8 sps:$4 sm:$0xff]  }
 0x275   :  { %3492 = vmatprep.subr.bf16.mxu1 %v5472_v14  ;;  %3936 = vmatpush1.bf16.msra.mxu0 %v5515_v27  ;;  %v5557_v14 = vld [vmem:[#allocation13 + $0x80] ss:$8 sps:$4 sm:$0xff]   ;;  %v5571_v27 = vld [vmem:[#allocation13 + $0x144] ss:$8 sps:$4 sm:$0xff]  }
 0x276   :  { %3937 = vmatprep.subr.bf16.mxu0 %v5520_v30  ;;  %v5572_v30 = vld [vmem:[#allocation13 + $0x130] ss:$8 sps:$4 sm:$0xff]  }
 0x278   :  { %3493 = vmatpush1.bf16.msra.mxu1 %v5470_v15  ;;  %v5562_v15 = vld [vmem:[#allocation13 + $0x174] ss:$8 sps:$4 sm:$0xff]  }
 0x279   :  { %3494 = vmatprep.subr.bf16.mxu1 %v5475_v18  ;;  %3938 = vmatpush1.bf16.msra.mxu0 %v5518_v33  ;;  %v5560_v18 = vld [vmem:[#allocation13 + $0x170] ss:$8 sps:$4 sm:$0xff]   ;;  %v5575_v33 = vld [vmem:[#allocation13 + $0x120] ss:$8 sps:$4 sm:$0xff]  }
 0x27a   :  { %3939 = vmatprep.subr.bf16.mxu0 %v5523_v35  ;;  %v5578_v35 = vld [vmem:[#allocation13 + $0x110] ss:$8 sps:$4 sm:$0xff]  }
 0x27c   :  { %3495 = vmatpush1.bf16.msra.mxu1 %v5473_v6  ;;  %v5566_v6 = vld [vmem:[#allocation13 + $0x150] ss:$8 sps:$4 sm:$0xff]  }
 0x27d   :  { %3496 = vmatprep.subr.bf16.mxu1 %v5478_v28  ;;  %3940 = vmatpush1.bf16.msra.mxu0 %v5521_v37  ;;  %v5574_v28 = vld [vmem:[#allocation13 + $0x134] ss:$8 sps:$4 sm:$0xff]   ;;  %v5581_v37 = vld [vmem:[#allocation13 + $0x100] ss:$8 sps:$4 sm:$0xff]  }
 0x27e   :  { %3941 = vmatprep.subr.bf16.mxu0 %v5526_v39  ;;  %v5584_v39 = vld [vmem:[#allocation13 + $0x1f0] ss:$8 sps:$4 sm:$0xff]  }
 0x280   :  { %3497 = vmatpush1.bf16.msra.mxu1 %v5476_v32  ;;  %v5577_v32 = vld [vmem:[#allocation13 + $0x124] ss:$8 sps:$4 sm:$0xff]  }
 0x281   :  { %3498 = vmatprep.subr.bf16.mxu1 %v5481_v34  ;;  %3942 = vmatpush1.bf16.msra.mxu0 %v5524_v41  ;;  %v5580_v34 = vld [vmem:[#allocation13 + $0x114] ss:$8 sps:$4 sm:$0xff]   ;;  %v5587_v41 = vld [vmem:[#allocation13 + $0x1e0] ss:$8 sps:$4 sm:$0xff]  }
 0x282   :  { %3943 = vmatprep.subr.bf16.mxu0 %v5529_v22  ;;  %v5590_v22 = vld [vmem:[#allocation13 + $0x1d0] ss:$8 sps:$4 sm:$0xff]  }
 0x284   :  { %3499 = vmatpush1.bf16.msra.mxu1 %v5479_v36  ;;  %v5583_v36 = vld [vmem:[#allocation13 + $0x104] ss:$8 sps:$4 sm:$0xff]  }
 0x285   :  { %3500 = vmatprep.subr.bf16.mxu1 %v5484_v38  ;;  %3944 = vmatpush1.bf16.msra.mxu0 %v5527_v43  ;;  %v5586_v38 = vld [vmem:[#allocation13 + $0x1f4] ss:$8 sps:$4 sm:$0xff]   ;;  %v5593_v43 = vld [vmem:[#allocation13 + $0x1c0] ss:$8 sps:$4 sm:$0xff]  }
 0x286   :  { %3945 = vmatprep.subr.bf16.mxu0 %v5532_v46  ;;  %v5596_v46 = vld [vmem:[#allocation13 + $0x1b0] ss:$8 sps:$4 sm:$0xff]  }
 0x288   :  { %3501 = vmatpush1.bf16.msra.mxu1 %v5482_v40  ;;  %v5589_v40 = vld [vmem:[#allocation13 + $0x1e4] ss:$8 sps:$4 sm:$0xff]  }
 0x289   :  { %3502 = vmatprep.subr.bf16.mxu1 %v5487_v42  ;;  %3946 = vmatpush1.bf16.msra.mxu0 %v5530_v48  ;;  %v5592_v42 = vld [vmem:[#allocation13 + $0x1d4] ss:$8 sps:$4 sm:$0xff]   ;;  %v5599_v48 = vld [vmem:[#allocation13 + $0x1a0] ss:$8 sps:$4 sm:$0xff]  }
 0x28a   :  { %3947 = vmatprep.subr.bf16.mxu0 %v5535_v50  ;;  %v5602_v50 = vld [vmem:[#allocation13 + $0x190] ss:$8 sps:$4 sm:$0xff]  }
 0x28c   :  { %3503 = vmatpush1.bf16.msra.mxu1 %v5485_v23  ;;  %v5595_v23 = vld [vmem:[#allocation13 + $0x1c4] ss:$8 sps:$4 sm:$0xff]  }
 0x28d   :  { %3504 = vmatprep.subr.bf16.mxu1 %v5490_v45  ;;  %3948 = vmatpush1.bf16.msra.mxu0 %v5533_v25  ;;  %v5598_v45 = vld [vmem:[#allocation13 + $0x1b4] ss:$8 sps:$4 sm:$0xff]  }
 0x28e   :  { %3949 = vmatprep.subr.bf16.mxu0 %v5538_v26  ;;  %v5605_v26 = vld [vmem:[#allocation13 + $0x180] ss:$8 sps:$4 sm:$0xff]  }
 0x290   :  { %3505 = vmatpush2.bf16.msra.mxu1 %v5488_v17  ;;  %v5601_v17 = vld [vmem:[#allocation13 + $0x1a4] ss:$8 sps:$4 sm:$0xff]  }
 0x291   :  { %3506 = vmatprep.subr.bf16.mxu1 %v5493_v51  ;;  %3950 = vmatpush2.bf16.msra.mxu0 %v5536_v31  ;;  %v5604_v51 = vld [vmem:[#allocation13 + $0x194] ss:$8 sps:$4 sm:$0xff]  }
 0x292   :  { %3951 = vmatprep.subr.bf16.mxu0 %v5541_v55 }
 0x294   :  { %3507 = vmatpush2.bf16.msra.mxu1 %v5491_v52 }
 0x295   :  { %3508 = vmatprep.subr.bf16.mxu1 %v5496_v53  ;;  %3952 = vmatpush2.bf16.msra.mxu0 %v5539_v57  ;;  %v5607_v53 = vld [vmem:[#allocation13 + $0x184] ss:$8 sps:$4 sm:$0xff]  }
 0x296   :  { %3953 = vmatprep.subr.bf16.mxu0 %v5544_v59 }
 0x298   :  { %3509 = vmatpush2.bf16.msra.mxu1 %v5494_v21 }
 0x299   :  { %3510 = vmatprep.subr.bf16.mxu1 %v5499_v54  ;;  %3954 = vmatpush2.bf16.msra.mxu0 %v5542_v61  ;;  %v2703_v54 = vld [vmem:[%s6148_s8] sm:$0xf] }
 0x29a   :  { %3955 = vmatprep.subr.bf16.mxu0 %v5547_v13  ;;  %v2708_v55 = vrot.slane %v2703_v54, %v6059_v7 }
 0x29c   :  { %3511 = vmatpush2.bf16.msra.mxu1 %v5497_v56  ;;  %v2712_v56 = vrot.slane %v2703_v54, %v6067_v16 }
 0x29d   :  { %3512 = vmatprep.subr.bf16.mxu1 %v5502_v58  ;;  %3956 = vmatpush2.bf16.msra.mxu0 %v5545_v0 }
 0x29e   :  { %3957 = vmatprep.subr.bf16.mxu0 %v5550_v2 }
 0x2a0   :  { %3513 = vmatpush2.bf16.msra.mxu1 %v5500_v60 }
 0x2a1   :  { %3514 = vmatprep.subr.bf16.mxu1 %v5505_v62  ;;  %3958 = vmatpush2.bf16.msra.mxu0 %v5548_v3 }
 0x2a2   :  { %3959 = vmatprep.subr.bf16.mxu0 %v5553_v5  ;;  %v2716_v5 = vrot.slane %v2703_v54, %v6084_v29  ;;  %v5611_v29 = vld [vmem:[#allocation14 + $0x30] sm:$0xff]  }
 0x2a4   :  { %3515 = vmatpush2.bf16.msra.mxu1 %v5503_v63 }
 0x2a5   :  { %3516 = vmatprep.subr.bf16.mxu1 %v5508_v1  ;;  %3960 = vmatpush2.bf16.msra.mxu0 %v5551_v9 }
 0x2a6   :  { %3961 = vmatprep.subr.bf16.mxu0 %v5556_v4 }
 0x2a8   :  { %3517 = vmatpush2.bf16.msra.mxu1 %v5506_v44 }
 0x2a9   :  { %3518 = vmatprep.subr.bf16.mxu1 %v5511_v47  ;;  %3962 = vmatpush2.bf16.msra.mxu0 %v5554_v11 }
 0x2aa   :  { %3963 = vmatprep.subr.bf16.mxu0 %v5559_v12 }
 0x2ac   :  { %3519 = vmatpush2.bf16.msra.mxu1 %v5509_v8  ;;  %v2720_v8 = vrot.slane %v2703_v54, %v6087_v49  ;;  %v5612_v49 = vld [vmem:[#allocation14 + $0x68] sm:$0xff]  }
 0x2ad   :  { %3964 = vmatpush2.bf16.msra.mxu0 %v5557_v14  ;;  %3974 = vmatprep.subr.bf16.mxu1 %v5562_v15 }
 0x2af   :  { %3521 = vmatmul.mubr.bf16.vlgmr.msra.gmra.mxu1 %v6111_v10  ;;  %v5569_v10 = vld [vmem:[#allocation13 + $0x140] ss:$8 sps:$4 sm:$0xff]  }
 0x2b0   :  { %3975 = vmatpush1.bf16.msra.mxu1 %v5560_v18 }
 0x2b1   :  { %3976 = vmatprep.subr.bf16.mxu1 %v5565_v19 }
 0x2b4   :  { %3977 = vmatpush1.bf16.msra.mxu1 %v5563_v20 }
 0x2b5   :  { %3978 = vmatprep.subr.bf16.mxu1 %v5568_v24 }
 0x2b8   :  { %3979 = vmatpush1.bf16.msra.mxu1 %v5566_v6  ;;  %v5608_v6 = vld [vmem:[#allocation14 + $0x78] sm:$0xff]  }
 0x2b9   :  { %3980 = vmatprep.subr.bf16.mxu1 %v5571_v27  ;;  %v5609_v27 = vld [vmem:[#allocation14 + $0x38] sm:$0xff]   ;;  %4791 = vmatprep.subr.bf16.mxu0 %v5608_v6 }
 0x2bc   :  { %3981 = vmatpush1.bf16.msra.mxu1 %v5569_v10  ;;  %v5610_v10 = vld [vmem:[#allocation14 + $0x70] sm:$0xff]  }
 0x2bd   :  { %3982 = vmatprep.subr.bf16.mxu1 %v5574_v28  ;;  %v5613_v28 = vld [vmem:[#allocation14 + $0x28] sm:$0xff]  }
 0x2c0   :  { %3983 = vmatpush1.bf16.msra.mxu1 %v5572_v30  ;;  %v5614_v30 = vld [vmem:[#allocation14 + $0x60] sm:$0xff]  }
 0x2c1   :  { %3984 = vmatprep.subr.bf16.mxu1 %v5577_v32  ;;  %v5615_v32 = vld [vmem:[#allocation14 + $0x20] sm:$0xff]  }
 0x2c4   :  { %3985 = vmatpush1.bf16.msra.mxu1 %v5575_v33  ;;  %v5616_v33 = vld [vmem:[#allocation14 + $0x58] sm:$0xff]  }
 0x2c5   :  { %3986 = vmatprep.subr.bf16.mxu1 %v5580_v34  ;;  %v5617_v34 = vld [vmem:[#allocation14 + $0x18] sm:$0xff]  }
 0x2c8   :  { %3987 = vmatpush1.bf16.msra.mxu1 %v5578_v35  ;;  %v5618_v35 = vld [vmem:[#allocation14 + $0x50] sm:$0xff]  }
 0x2c9   :  { %3988 = vmatprep.subr.bf16.mxu1 %v5583_v36  ;;  %v5619_v36 = vld [vmem:[#allocation14 + $0x10] sm:$0xff]  }
 0x2cc   :  { %3989 = vmatpush1.bf16.msra.mxu1 %v5581_v37  ;;  %v5620_v37 = vld [vmem:[#allocation14 + $0x48] sm:$0xff]  }
 0x2cd   :  { %3990 = vmatprep.subr.bf16.mxu1 %v5586_v38  ;;  %v5621_v38 = vld [vmem:[#allocation14 + $0x8] sm:$0xff]  }
 0x2d0   :  { %3991 = vmatpush2.bf16.msra.mxu1 %v5584_v39  ;;  %v5622_v39 = vld [vmem:[#allocation14 + $0x40] sm:$0xff]  }
 0x2d1   :  { %3992 = vmatprep.subr.bf16.mxu1 %v5589_v40  ;;  %v5623_v40 = vld [vmem:[#allocation14] sm:$0xff]  }
 0x2d4   :  { %3993 = vmatpush2.bf16.msra.mxu1 %v5587_v41 }
 0x2d5   :  { %3994 = vmatprep.subr.bf16.mxu1 %v5592_v42 }
 0x2d8   :  { %3995 = vmatpush2.bf16.msra.mxu1 %v5590_v22 }
 0x2d9   :  { %3996 = vmatprep.subr.bf16.mxu1 %v5595_v23 }
 0x2dc   :  { %3997 = vmatpush2.bf16.msra.mxu1 %v5593_v43  ;;  %v3601_v43 = vld [vmem:[%s6150_s10] sm:$0x3]  ;;  %s4221_s10 = sshll.u32 %s5876_s30, 4  ;;  %s4222_s10 = int_to_ptr.vmem [resolvable:$true] %s4221_s10 }
 0x2dd   :  { %3998 = vmatprep.subr.bf16.mxu1 %v5598_v45  ;;  %v3606_v45 = vrot.slane %v3601_v43, %v6059_v7  ;;  %s5788_s16 = scalar_lea.vmem %s4222_s10, 512  ;;  %p5793_p13 = scmp.lt.s32.totalorder %s4222_s10, %s4222_s10 }
 0x2de   :  { %p5789_p12 = scmp.ne.s32.totalorder %s4222_s10, %s5788_s16  ;;  %p5794_p0 = scmp.lt.s32.totalorder %s5788_s16, %s5788_s16 }
 0x2e0   :  { %3999 = vmatpush2.bf16.msra.mxu1 %v5596_v46  ;;  %v3610_v46 = vrot.slane %v3601_v43, %v6067_v16  ;;  %p5795_p1 = por %p5794_p0, %p5793_p13 }
 0x2e1   :  { %4000 = vmatprep.subr.bf16.mxu1 %v5601_v17 }
 0x2e2   :  { %p5796_p2 = pnand %p5795_p1, %p5789_p12 }
 0x2e4   :  { %4001 = vmatpush2.bf16.msra.mxu1 %v5599_v48 }
 0x2e5   :  { %4002 = vmatprep.subr.bf16.mxu1 %v5604_v51 }
 0x2e8   :  { %4003 = vmatpush2.bf16.msra.mxu1 %v5602_v50 }
 0x2e9   :  { %4004 = vmatprep.subr.bf16.mxu1 %v5607_v53 }
 0x2ec   :  { %4005 = vmatpush2.bf16.msra.mxu1 %v5605_v26 }
 0x2ef   :  { %v3399_v52 = vpop.f32.mrf.mxu0 }
 0x2f0   :  { %v3400_v57 = vadd.f32 %v3399_v52, %v2708_v55 }
 0x2f1   :  { %v3401_v25 = vpop.f32.mrf.mxu0 }
 0x2f2   :  { %v3402_v60 = vadd.f32 %v3401_v25, %v2712_v56 }
 0x2f3   :  { %v3403_v21 = vpop.f32.mrf.mxu0 }
 0x2f5   :  { %v3404_v31 = vpop.f32.mrf.mxu0 }
 0x32f   :  { %v3481_v58 = vpop.f32.mrf.mxu0  ;;  %v3440_v59 = vpop.f32.mrf.mxu1 }
 0x330   :  { %v3441_v61 = vadd.f32 %v3440_v59, %v3400_v57  ;;  %v3482_v9 = vadd.f32 %v3481_v58, %v2716_v5 }
 0x331   :  { %v3483_v62 = vpop.f32.mrf.mxu0  ;;  %v3442_v13 = vpop.f32.mrf.mxu1 }
 0x332   :  { %3529 = vst [vmem:[#allocation17] sm:$0xff] %v3441_v61  ;;  %v3443_v63 = vadd.f32 %v3442_v13, %v3402_v60  ;;  %v3533_v44 = vpack.c.bf16 %v3441_v61, %v3441_v61  ;;  %v3484_v11 = vadd.f32 %v3483_v62, %v2720_v8 }
 0x333   :  { %v3485_v0 = vpop.f32.mrf.mxu0  ;;  %v3444_v1 = vpop.f32.mrf.mxu1 }
 0x334   :  { %3530 = vst [vmem:[#allocation17 + $0x8] sm:$0xff] %v3443_v63  ;;  %v3534_v2 = vpack.c.bf16 %v3443_v63, %v3443_v63 }
 0x335   :  { %v3486_v3 = vpop.f32.mrf.mxu0  ;;  %v3445_v47 = vpop.f32.mrf.mxu1 }
 0x336   :  { %3965 = vmatprep.mubr.bf16.mxu0 %v3534_v2 }
 0x337   :  { %3966 = vmatmul.mubr.bf16.vlgmr.msra.gmra.mxu0 %v3533_v44 }
 0x338   :  { %4792 = vmatpush3.bf16.msra.mxu0 %v5609_v27 }
 0x339   :  { %4793 = vmatprep.subr.bf16.mxu0 %v5610_v10 }
 0x33c   :  { %4794 = vmatpush3.bf16.msra.mxu0 %v5611_v29 }
 0x33d   :  { %4795 = vmatprep.subr.bf16.mxu0 %v5612_v49 }
 0x340   :  { %4796 = vmatpush3.bf16.msra.mxu0 %v5613_v28 }
 0x341   :  { %4797 = vmatprep.subr.bf16.mxu0 %v5614_v30 }
 0x344   :  { %4798 = vmatpush3.bf16.msra.mxu0 %v5615_v32 }
 0x345   :  { %4799 = vmatprep.subr.bf16.mxu0 %v5616_v33 }
 0x348   :  { %4800 = vmatpush3.bf16.msra.mxu0 %v5617_v34 }
 0x349   :  { %4801 = vmatprep.subr.bf16.mxu0 %v5618_v35 }
 0x34c   :  { %4802 = vmatpush3.bf16.msra.mxu0 %v5619_v36 }
 0x34d   :  { %4803 = vmatprep.subr.bf16.mxu0 %v5620_v37 }
 0x350   :  { %4804 = vmatpush3.bf16.msra.mxu0 %v5621_v38 }
 0x351   :  { %4805 = vmatprep.subr.bf16.mxu0 %v5622_v39 }
 0x354   :  { %4806 = vmatpush3.bf16.msra.mxu0 %v5623_v40 }
 0x36f   :  { %v3522_v4 = vpop.f32.mrf.mxu1 }
 0x370   :  { %v3523_v12 = vadd.f32 %v3522_v4, %v3482_v9 }
 0x371   :  { %v3524_v14 = vpop.f32.mrf.mxu1 }
 0x372   :  { %3531 = vst [vmem:[#allocation17 + $0x10] sm:$0xff] %v3523_v12  ;;  %v3525_v15 = vadd.f32 %v3524_v14, %v3484_v11  ;;  %v3535_v20 = vpack.c.bf16 %v3523_v12, %v3523_v12 }
 0x373   :  { %v3526_v18 = vpop.f32.mrf.mxu1 }
 0x374   :  { %3532 = vst [vmem:[#allocation17 + $0x18] sm:$0xff] %v3525_v15  ;;  %v3536_v19 = vpack.c.bf16 %v3525_v15, %v3525_v15 }
 0x375   :  { %v3527_v24 = vpop.f32.mrf.mxu1 }
 0x376   :  { %4006 = vmatprep.mubr.bf16.mxu1 %v3536_v19 }
 0x377   :  { %4007 = vmatmul.mubr.bf16.vlgmr.msra.gmra.mxu1 %v3535_v20 }
 0x3f7   :  { %v3967_v41 = vpop.f32.mrf.mxu0 }
 0x3f8   :  { %v3968_v17 = vadd.f32 %v3967_v41, %v3606_v45 }
 0x3f9   :  { %v3969_v42 = vpop.f32.mrf.mxu0 }
 0x3fa   :  { %v3970_v51 = vadd.f32 %v3969_v42, %v3610_v46 }
 0x3fb   :  { %v3971_v22 = vpop.f32.mrf.mxu0 }
 0x3fd   :  { %v3972_v23 = vpop.f32.mrf.mxu0 }
 0x437   :  { %v4008_v48 = vpop.f32.mrf.mxu1 }
 0x438   :  { %v4009_v50 = vadd.f32 %v4008_v48, %v3968_v17 }
 0x439   :  { %v4010_v52 = vpop.f32.mrf.mxu1 }
 0x43a   :  { %v4011_v25 = vadd.f32 %v4010_v52, %v3970_v51  ;;  %v4015_v53 = vmax.f32 %v4009_v50, 0.0 }
 0x43b   :  { %v4012_v26 = vpop.f32.mrf.mxu1 }
 0x43c   :  { %v4016_v21 = vmax.f32 %v4011_v25, 0.0  ;;  %v4017_v55 = vpack.c.bf16 %v4015_v53, %v4015_v53 }
 0x43d   :  { %v4013_v31 = vpop.f32.mrf.mxu1 }
 0x43e   :  { %v4018_v54 = vpack.c.bf16 %v4016_v21, %v4016_v21 }
 0x440   :  { %4186 = vmatprep.mubr.bf16.mxu0 %v4018_v54 }
 0x441   :  { %4187 = vmatmul.mubr.bf16.vlgmr.msra.gmra.mxu0 %v4017_v55 }
 0x442   :  { %5799 = shalt.err (!%p5796_p2)
}
 0x443   :  { %4224 = dma.vmem_to_hbm [thread:$0]  %s4222_s10, 512, %s6154_s14, [#allocation18]  }
 0x444   :  { %s5877_s1 = smov [#allocation19]  }
 0x445   :  { %s4231_s18 = sshll.u32 %s5877_s1, 4  ;;  %s4232_s18 = int_to_ptr.vmem [resolvable:$true] %s4231_s18 }
 0x446   :  { %s5808_s19 = scalar_lea.vmem %s4232_s18, 512  ;;  %p5813_p4 = scmp.lt.s32.totalorder %s4232_s18, %s4232_s18 }
 0x447   :  { %p5809_p3 = scmp.ne.s32.totalorder %s4232_s18, %s5808_s19  ;;  %p5814_p5 = scmp.lt.s32.totalorder %s5808_s19, %s5808_s19 }
 0x449   :  { %p5815_p6 = por %p5814_p5, %p5813_p4 }
 0x44b   :  { %p5816_p7 = pnand %p5815_p6, %p5809_p3 }
 0x44d   :  { %5819 = shalt.err (!%p5816_p7)
}
 0x44e   :  { %4234 = dma.vmem_to_hbm [thread:$0]  %s4232_s18, 512, %s6155_s15, [#allocation18]   ;;  %v4773_v16 = vld [vmem:[%s6152_s12] ss:$0 sm:$0xff]  ;;  %v4201_v63 = vld [vmem:[#allocation7] sm:$0xff] }
 0x44f   :  { %v4202_v0 = vmul.f32 0.5, %v4201_v63  ;;  %s5878_s14 = smov [#allocation16]  }
 0x450   :  { %s4211_s15 = sshll.u32 %s5878_s14, 4  ;;  %s4212_s15 = int_to_ptr.vmem [resolvable:$true] %s4211_s15 }
 0x451   :  { %s5828_s12 = scalar_lea.vmem %s4212_s15, 128  ;;  %p5833_p9 = scmp.lt.s32.totalorder %s4212_s15, %s4212_s15 }
 0x452   :  { %p5829_p8 = scmp.ne.s32.totalorder %s4212_s15, %s5828_s12  ;;  %p5834_p10 = scmp.lt.s32.totalorder %s5828_s12, %s5828_s12 }
 0x454   :  { %p5835_p11 = por %p5834_p10, %p5833_p9 }
 0x456   :  { %p5836_p12 = pnand %p5835_p11, %p5829_p8 }
 0x501   :  { %v4807_v7 = vpop.f32.mrf.mxu0 }
 0x503   :  { %v4808_v56 = vpop.f32.mrf.mxu0 }
 0x504   :  { %v4809_v57 = vadd.f32 %v4808_v56, %v4807_v7 }
 0x505   :  { %v4810_v58 = vpop.f32.mrf.mxu0 }
 0x506   :  { %v4189_v59 = vadd.f32 %v4809_v57, %v4773_v16 }
 0x507   :  { %v4811_v60 = vpop.f32.mrf.mxu0 }
 0x508   :  { %v4790_v61 = vmul.f32 -1.442695, %v4189_v59 }
 0x50a   :  { %5624 = vpow2.f32 %v4790_v61 }
 0x517   :  { %v5625_v62 = vpop.eup %5624 }
 0x518   :  { %v4197_v13 = vadd.f32 1.0, %v5625_v62 }
 0x51a   :  { %5626 = vrcp.f32 %v4197_v13 }
 0x527   :  { %v5627_v1 = vpop.eup %5626 }
 0x528   :  { %v4200_v2 = vmul.f32 0.5, %v5627_v1 }
 0x52a   :  { %v4203_v44 = vadd.f32 %v4202_v0, %v4200_v2 }
 0x52c   :  { %4204 = vst [vmem:[#allocation16] sm:$0xff] %v4203_v44 }
 0x52d   :  { %5839 = shalt.err (!%p5836_p12)
}
 0x52e   :  { %4214 = dma.vmem_to_hbm [thread:$0]  %s4212_s15, 128, %s6153_s13, [#allocation4]  }
 0x52f   :  { %5858 = dma.done.wait [#allocation4], 128  }
 0x530   :  { %5859 = vsyncadd [#allocation4], 4294967168 }
 0x531   :  { %5860 = dma.done.wait [#allocation18], 1024  }
 0x532   :  { %5861 = vsyncadd [#allocation18], 4294966272 }
 0x533   :  { %4244 = vsyncpa [#allocation3], 1 }
 0x534   :  { %4245 = vsyncpa [#allocation6], 1 }
 0x535   :  { %4246 = vsyncpa [#allocation9], 1 }
 0x536   :  { %4247 = vsyncpa [#allocation12], 1 }
 0x537   :  { %4248 = vsyncpa [#allocation15], 1 }
 0x538   :  { %4249 = vsyncpa [#allocation4], 1 }
 0x539   :  { %4250 = vsyncpa [#allocation18], 1 }

</bundles_post_ra>
